<compile_context>
chip_gen: v7x
topology: tpu7x:2x2x1
jax: 0.10.0
libtpu: 0.0.40
codegen_flags: <defaults>
</compile_context>

<pallas_src>
import jax
import jax.numpy as jnp
from jax.experimental import pallas as pl
from jax.experimental.pallas import tpu as pltpu

INPUT_DIM = 28 * 28      # 784
HIDDEN_DIM = 100
OUTPUT_DIM = 10

HIDDEN_PAD = 128         # lane-dense hidden width (zero-padded)
OUTPUT_PAD = 128         # lane-dense output width (zero-padded, sliced after)
DEFAULT_TB = 256         # batch-tile rows per grid step (multiple of 8 and 128)


def mlp_kernel(x_ref, w1_ref, b1_ref, w2_ref, b2_ref, o_ref):
    # fc1 on the MXU: bf16 operands, f32 accumulation.
    h = jnp.dot(x_ref[...], w1_ref[...], preferred_element_type=jnp.float32)
    # Bias add + ReLU in f32 on the VPU (padded hidden lanes stay exactly 0).
    h = jnp.maximum(h + b1_ref[...], 0.0)
    # fc2: cast activations to bf16 for the MXU, accumulate in f32.
    out = jnp.dot(h.astype(jnp.bfloat16), w2_ref[...],
                  preferred_element_type=jnp.float32)
    o_ref[...] = (out + b2_ref[...]).astype(o_ref.dtype)


def feedforward_forward(x, w1p, b1p, w2p, b2p, *, block_batch=DEFAULT_TB):
    """Pallas forward for FeedforwardNeuralNetModel.

    x:   (B, INPUT_DIM) float32
    w1p: (INPUT_DIM, HIDDEN_PAD) bfloat16   b1p: (1, HIDDEN_PAD) float32
    w2p: (HIDDEN_PAD, OUTPUT_PAD) bfloat16  b2p: (1, OUTPUT_PAD) float32
    returns: (B, OUTPUT_DIM) float32
    """
    B = x.shape[0]
    tb = block_batch
    num_tiles = pl.cdiv(B, tb)
    padded_b = num_tiles * tb

    x_bf16 = x.astype(jnp.bfloat16)
    if padded_b != B:
        # Zero-pad the ragged last tile; padded rows are sliced off below.
        x_bf16 = jnp.pad(x_bf16, ((0, padded_b - B), (0, 0)))

    flops = 2 * padded_b * (INPUT_DIM * HIDDEN_PAD + HIDDEN_PAD * OUTPUT_PAD)
    bytes_accessed = (
        padded_b * INPUT_DIM * 2          # x stream (bf16)
        + INPUT_DIM * HIDDEN_PAD * 2      # w1 (bf16)
        + HIDDEN_PAD * OUTPUT_PAD * 2     # w2 (bf16)
        + (HIDDEN_PAD + OUTPUT_PAD) * 4   # biases (f32)
        + padded_b * OUTPUT_PAD * 4       # output writeback (f32)
    )

    out_padded = pl.pallas_call(
        mlp_kernel,
        out_shape=jax.ShapeDtypeStruct((padded_b, OUTPUT_PAD), jnp.float32),
        grid=(num_tiles,),
        in_specs=[
            pl.BlockSpec((tb, INPUT_DIM), lambda i: (i, 0)),
            pl.BlockSpec((INPUT_DIM, HIDDEN_PAD), lambda i: (0, 0)),
            pl.BlockSpec((1, HIDDEN_PAD), lambda i: (0, 0)),
            pl.BlockSpec((HIDDEN_PAD, OUTPUT_PAD), lambda i: (0, 0)),
            pl.BlockSpec((1, OUTPUT_PAD), lambda i: (0, 0)),
        ],
        out_specs=pl.BlockSpec((tb, OUTPUT_PAD), lambda i: (i, 0)),
        compiler_params=pltpu.CompilerParams(
            dimension_semantics=("parallel",),
        ),
        cost_estimate=pl.CostEstimate(
            flops=flops, transcendentals=0, bytes_accessed=bytes_accessed),
    )(x_bf16, w1p, b1p, w2p, b2p)

    # Drop batch padding and the padded output lanes.
    return out_padded[:B, :OUTPUT_DIM]


def init_params(key):
    """Deterministic init mimicking PyTorch nn.Linear (U[-1/sqrt(fan_in), +]),
    stored as (in, out) = transpose of PyTorch's (out, in) layout."""
    k1, k2, k3, k4 = jax.random.split(key, 4)
    bound1 = 1.0 / (INPUT_DIM ** 0.5)
    bound2 = 1.0 / (HIDDEN_DIM ** 0.5)
    w1 = jax.random.uniform(k1, (INPUT_DIM, HIDDEN_DIM), jnp.float32, -bound1, bound1)
    b1 = jax.random.uniform(k2, (HIDDEN_DIM,), jnp.float32, -bound1, bound1)
    w2 = jax.random.uniform(k3, (HIDDEN_DIM, OUTPUT_DIM), jnp.float32, -bound2, bound2)
    b2 = jax.random.uniform(k4, (OUTPUT_DIM,), jnp.float32, -bound2, bound2)
    return w1, b1, w2, b2


def prepare_params(w1, b1, w2, b2):
    """One-time layout plumbing: zero-pad hidden/output dims to 128 lanes and
    cast the matmul operands to bf16 (biases stay f32 for the VPU add)."""
    w1p = jnp.zeros((INPUT_DIM, HIDDEN_PAD), jnp.float32).at[:, :HIDDEN_DIM].set(w1)
    b1p = jnp.zeros((1, HIDDEN_PAD), jnp.float32).at[:, :HIDDEN_DIM].set(b1)
    w2p = jnp.zeros((HIDDEN_PAD, OUTPUT_PAD), jnp.float32).at[:HIDDEN_DIM, :OUTPUT_DIM].set(w2)
    b2p = jnp.zeros((1, OUTPUT_PAD), jnp.float32).at[:, :OUTPUT_DIM].set(b2)
    return w1p.astype(jnp.bfloat16), b1p, w2p.astype(jnp.bfloat16), b2p


def reference_forward(x, w1, b1, w2, b2):
    h = jnp.maximum(x @ w1 + b1, 0.0)
    return h @ w2 + b2


if __name__ == "__main__":
    key = jax.random.PRNGKey(0)
    kx, kp = jax.random.split(key)

    batch = 8
    x = jax.random.normal(kx, (batch, INPUT_DIM), jnp.float32)
    w1, b1, w2, b2 = init_params(kp)
    w1p, b1p, w2p, b2p = prepare_params(w1, b1, w2, b2)

    out = feedforward_forward(x, w1p, b1p, w2p, b2p)
    out = jax.block_until_ready(out)
    assert out.shape == (batch, OUTPUT_DIM)

    # bf16-matched reference (same operand quantization as the kernel's MXU inputs).
    x_q = x.astype(jnp.bfloat16).astype(jnp.float32)
    w1_q = w1.astype(jnp.bfloat16).astype(jnp.float32)
    w2_q = w2.astype(jnp.bfloat16).astype(jnp.float32)
    h_q = jnp.maximum(x_q @ w1_q + b1, 0.0).astype(jnp.bfloat16).astype(jnp.float32)
    ref_q = h_q @ w2_q + b2
    assert jnp.allclose(out, ref_q, atol=2e-2, rtol=2e-2), \
        float(jnp.max(jnp.abs(out - ref_q)))

    # Sanity check against the full-f32 PyTorch-semantics reference.
    ref_f32 = reference_forward(x, w1, b1, w2, b2)
    assert jnp.allclose(out, ref_f32, atol=1e-1, rtol=1e-1)

    print("KERNEL_OK")
</pallas_src>

<mosaic_0001>
module attributes {stable_mosaic.version = 11 : i64} {
  func.func @mlp_kernel(%arg0: i32, %arg1: memref<256x784xbf16, #tpu.memory_space<vmem>>, %arg2: memref<784x128xbf16, #tpu.memory_space<vmem>>, %arg3: memref<1x128xf32, #tpu.memory_space<vmem>>, %arg4: memref<128x128xbf16, #tpu.memory_space<vmem>>, %arg5: memref<1x128xf32, #tpu.memory_space<vmem>>, %arg6: memref<256x128xf32, #tpu.memory_space<vmem>>) attributes {dimension_semantics = [#tpu.dimension_semantics<parallel>], iteration_bounds = array<i64: 1>, scalar_prefetch = 0 : i64, scratch_operands = 0 : i64, tpu.core_type = #tpu.core_type<tc>, window_params = [{transform_indices = @transform_0, window_bounds = array<i64: 256, 784>}, {pipeline_mode = #tpu.pipeline_mode<synchronous>, transform_indices = @transform_1, window_bounds = array<i64: 784, 128>}, {pipeline_mode = #tpu.pipeline_mode<synchronous>, transform_indices = @transform_2, window_bounds = array<i64: 1, 128>}, {pipeline_mode = #tpu.pipeline_mode<synchronous>, transform_indices = @transform_3, window_bounds = array<i64: 128, 128>}, {pipeline_mode = #tpu.pipeline_mode<synchronous>, transform_indices = @transform_4, window_bounds = array<i64: 1, 128>}, {transform_indices = @transform_5, window_bounds = array<i64: 256, 128>}]} {
    %c0 = arith.constant 0 : index
    %c0_0 = arith.constant 0 : index
    %0 = vector.load %arg1[%c0, %c0_0] : memref<256x784xbf16, #tpu.memory_space<vmem>>, vector<256x784xbf16>
    %c0_1 = arith.constant 0 : index
    %c0_2 = arith.constant 0 : index
    %1 = vector.load %arg2[%c0_1, %c0_2] : memref<784x128xbf16, #tpu.memory_space<vmem>>, vector<784x128xbf16>
    %cst = arith.constant dense<0.000000e+00> : vector<256x128xf32>
    %2 = tpu.matmul %0, %1, %cst {dimension_numbers = #tpu.dot_dimension_numbers<[1], [0], [0], [1], [0, 0, 1, 1], [], []>} : vector<256x784xbf16>, vector<784x128xbf16>, vector<256x128xf32> -> vector<256x128xf32>
    %c0_3 = arith.constant 0 : index
    %c0_4 = arith.constant 0 : index
    %3 = vector.load %arg3[%c0_3, %c0_4] : memref<1x128xf32, #tpu.memory_space<vmem>>, vector<1x128xf32>
    %4 = vector.broadcast %3 : vector<1x128xf32> to vector<256x128xf32>
    %5 = arith.addf %2, %4 : vector<256x128xf32>
    %cst_5 = arith.constant 0.000000e+00 : f32
    %6 = vector.broadcast %cst_5 : f32 to vector<256x128xf32>
    %7 = arith.maximumf %5, %6 : vector<256x128xf32>
    %8 = arith.truncf %7 : vector<256x128xf32> to vector<256x128xbf16>
    %c0_6 = arith.constant 0 : index
    %c0_7 = arith.constant 0 : index
    %9 = vector.load %arg4[%c0_6, %c0_7] : memref<128x128xbf16, #tpu.memory_space<vmem>>, vector<128x128xbf16>
    %cst_8 = arith.constant dense<0.000000e+00> : vector<256x128xf32>
    %10 = tpu.matmul %8, %9, %cst_8 {dimension_numbers = #tpu.dot_dimension_numbers<[1], [0], [0], [1], [0, 0, 1, 1], [], []>} : vector<256x128xbf16>, vector<128x128xbf16>, vector<256x128xf32> -> vector<256x128xf32>
    %c0_9 = arith.constant 0 : index
    %c0_10 = arith.constant 0 : index
    %11 = vector.load %arg5[%c0_9, %c0_10] : memref<1x128xf32, #tpu.memory_space<vmem>>, vector<1x128xf32>
    %12 = vector.broadcast %11 : vector<1x128xf32> to vector<256x128xf32>
    %13 = arith.addf %10, %12 : vector<256x128xf32>
    %c0_11 = arith.constant 0 : index
    %c0_12 = arith.constant 0 : index
    %14 = vector.load %arg6[%c0_11, %c0_12] : memref<256x128xf32, #tpu.memory_space<vmem>>, vector<256x128xf32>
    tpu.vector_store %arg6[%c0_11, %c0_12], %13 {strides = array<i32>} : memref<256x128xf32, #tpu.memory_space<vmem>>, vector<256x128xf32>,
    return
  }
  func.func @transform_0(%arg0: i32) -> (i32, i32) {
    %c0_i32 = arith.constant 0 : i32
    %c0_i32_0 = arith.constant 0 : i32
    return %arg0, %c0_i32 : i32, i32
  }
  func.func @transform_1(%arg0: i32) -> (i32, i32) {
    %c0_i32 = arith.constant 0 : i32
    %c0_i32_0 = arith.constant 0 : i32
    %c0_i32_1 = arith.constant 0 : i32
    return %c0_i32, %c0_i32_0 : i32, i32
  }
  func.func @transform_2(%arg0: i32) -> (i32, i32) {
    %c0_i32 = arith.constant 0 : i32
    %c0_i32_0 = arith.constant 0 : i32
    %c0_i32_1 = arith.constant 0 : i32
    return %c0_i32, %c0_i32_0 : i32, i32
  }
  func.func @transform_3(%arg0: i32) -> (i32, i32) {
    %c0_i32 = arith.constant 0 : i32
    %c0_i32_0 = arith.constant 0 : i32
    %c0_i32_1 = arith.constant 0 : i32
    return %c0_i32, %c0_i32_0 : i32, i32
  }
  func.func @transform_4(%arg0: i32) -> (i32, i32) {
    %c0_i32 = arith.constant 0 : i32
    %c0_i32_0 = arith.constant 0 : i32
    %c0_i32_1 = arith.constant 0 : i32
    return %c0_i32, %c0_i32_0 : i32, i32
  }
  func.func @transform_5(%arg0: i32) -> (i32, i32) {
    %c0_i32 = arith.constant 0 : i32
    %c0_i32_0 = arith.constant 0 : i32
    return %arg0, %c0_i32 : i32, i32
  }
}

</mosaic_0001>

<bundles_post_ra>
// kernel: tpu_custom_call.1
= control target key start
LH: loop header
LB: loop body
LE: loop exit
PB: predicated region body
PF: predicated region fallthrough
CT: control target
= control target key end

     0   :  { %s3812_s0 = inlined_call_operand.vmem [shape: bf16[256,784], index: 0, kind: input, shape index: {}]   ;;  %s3813_s1 = inlined_call_operand.vmem [shape: bf16[784,128], index: 1, kind: input, shape index: {}]   ;;  %s3814_s2 = inlined_call_operand.vmem [shape: f32[1,128], index: 2, kind: input, shape index: {}]   ;;  %s3815_s3 = inlined_call_operand.vmem [shape: bf16[128,128], index: 3, kind: input, shape index: {}]   ;;  %s3816_s4 = inlined_call_operand.vmem [shape: f32[1,128], index: 4, kind: input, shape index: {}]   ;;  %s3817_s5 = inlined_call_operand.hbm [shape: f32[256,128], index: 5, kind: output, shape index: {}]  }
   0x1   :  { %v2779_v0 = vld [vmem:[%s3813_s1 + $0x40] sm:$0xff]   ;;  %v2783_v4 = vld [vmem:[%s3813_s1 + $0x48] sm:$0xff]   ;;  %v2787_v8 = vld [vmem:[%s3813_s1 + $0x50] sm:$0xff]  }
   0x2   :  { %v2780_v1 = vld [vmem:[%s3813_s1] sm:$0xff]   ;;  %2317 = vmatprep.subr.bf16.mxu0 %v2779_v0  ;;  %v2784_v5 = vld [vmem:[%s3813_s1 + $0x8] sm:$0xff]   ;;  %v2788_v9 = vld [vmem:[%s3813_s1 + $0x10] sm:$0xff]  }
   0x3   :  { %v2781_v2 = vld [vmem:[%s3813_s1 + $0xc0] sm:$0xff]   ;;  %2318 = vmatpush3.bf16.msra.mxu0 %v2780_v1  ;;  %v2785_v6 = vld [vmem:[%s3813_s1 + $0xc8] sm:$0xff]   ;;  %v2789_v10 = vld [vmem:[%s3813_s1 + $0xd0] sm:$0xff]  }
   0x4   :  { %v2782_v3 = vld [vmem:[%s3813_s1 + $0x80] sm:$0xff]   ;;  %2429 = vmatprep.subr.bf16.mxu1 %v2781_v2  ;;  %2319 = vmatprep.subr.bf16.mxu0 %v2783_v4  ;;  %v2786_v7 = vld [vmem:[%s3813_s1 + $0x88] sm:$0xff]   ;;  %v2790_v11 = vld [vmem:[%s3813_s1 + $0x90] sm:$0xff]  }
   0x5   :  { %2430 = vmatpush3.bf16.msra.mxu1 %v2782_v3  ;;  %v2791_v12 = vld [vmem:[%s3813_s1 + $0x58] sm:$0xff]   ;;  %v2795_v16 = vld [vmem:[%s3813_s1 + $0x60] sm:$0xff]   ;;  %v2799_v20 = vld [vmem:[%s3813_s1 + $0x68] sm:$0xff]  }
   0x6   :  { %2431 = vmatprep.subr.bf16.mxu1 %v2785_v6  ;;  %v2792_v13 = vld [vmem:[%s3813_s1 + $0x18] sm:$0xff]   ;;  %v2796_v17 = vld [vmem:[%s3813_s1 + $0x20] sm:$0xff]   ;;  %v2800_v21 = vld [vmem:[%s3813_s1 + $0x28] sm:$0xff]  }
   0x7   :  { %2320 = vmatpush3.bf16.msra.mxu0 %v2784_v5  ;;  %v2793_v14 = vld [vmem:[%s3813_s1 + $0xd8] sm:$0xff]   ;;  %v2797_v18 = vld [vmem:[%s3813_s1 + $0xe0] sm:$0xff]   ;;  %v2801_v22 = vld [vmem:[%s3813_s1 + $0xe8] sm:$0xff]  }
   0x8   :  { %2321 = vmatprep.subr.bf16.mxu0 %v2787_v8  ;;  %v2794_v15 = vld [vmem:[%s3813_s1 + $0x98] sm:$0xff]   ;;  %v2798_v19 = vld [vmem:[%s3813_s1 + $0xa0] sm:$0xff]   ;;  %v2802_v23 = vld [vmem:[%s3813_s1 + $0xa8] sm:$0xff]  }
   0x9   :  { %2432 = vmatpush3.bf16.msra.mxu1 %v2786_v7  ;;  %v2803_v24 = vld [vmem:[%s3813_s1 + $0x70] sm:$0xff]   ;;  %v2807_v28 = vld [vmem:[%s3813_s1 + $0x78] sm:$0xff]   ;;  %v2812_v32 = vld [vmem:[%s3812_s0 + $0x4] ss:$28 sps:$4 sm:$0xff]  }
   0xa   :  { %2433 = vmatprep.subr.bf16.mxu1 %v2789_v10  ;;  %v2804_v25 = vld [vmem:[%s3813_s1 + $0x30] sm:$0xff]   ;;  %v2808_v29 = vld [vmem:[%s3813_s1 + $0x38] sm:$0xff]   ;;  %1190 = vmatprep.mubr.bf16.mxu0 %v2812_v32  ;;  %v2814_v34 = vld [vmem:[%s3813_s1 + $0x140] sm:$0xff]  }
   0xb   :  { %2322 = vmatpush3.bf16.msra.mxu0 %v2788_v9  ;;  %v2805_v26 = vld [vmem:[%s3813_s1 + $0xf0] sm:$0xff]   ;;  %v2809_v30 = vld [vmem:[%s3813_s1 + $0xf8] sm:$0xff]   ;;  %v2815_v35 = vld [vmem:[%s3812_s0 + $0x8] ss:$28 sps:$4 sm:$0xff]  }
   0xc   :  { %2323 = vmatprep.subr.bf16.mxu0 %v2791_v12  ;;  %v2806_v27 = vld [vmem:[%s3813_s1 + $0xb0] sm:$0xff]   ;;  %v2810_v31 = vld [vmem:[%s3812_s0] ss:$28 sps:$4 sm:$0xff]   ;;  %v2817_v36 = vld [vmem:[%s3812_s0 + $0xc] ss:$28 sps:$4 sm:$0xff]  }
   0xd   :  { %2434 = vmatpush3.bf16.msra.mxu1 %v2790_v11  ;;  %v2813_v33 = vld [vmem:[%s3813_s1 + $0xb8] sm:$0xff]   ;;  %v2818_v37 = vld [vmem:[%s3813_s1 + $0x100] sm:$0xff]   ;;  %1351 = vmatprep.mubr.bf16.mxu1 %v2817_v36  ;;  %v2825_v41 = vld [vmem:[%s3812_s0 + $0x74] ss:$28 sps:$4 sm:$0xff]  }
   0xe   :  { %2435 = vmatprep.subr.bf16.mxu1 %v2793_v14  ;;  %v2819_v38 = vld [vmem:[%s3812_s0 + $0x3c] ss:$28 sps:$4 sm:$0xff]   ;;  %v2822_v39 = vld [vmem:[%s3812_s0 + $0x44] ss:$28 sps:$4 sm:$0xff]   ;;  %v2828_v42 = vld [vmem:[%s3813_s1 + $0x148] sm:$0xff]  }
   0xf   :  { %2324 = vmatpush3.bf16.msra.mxu0 %v2792_v13  ;;  %v2821_v40 = vld [vmem:[%s3812_s0 + $0x38] ss:$28 sps:$4 sm:$0xff]   ;;  %v2824_v43 = vld [vmem:[%s3812_s0 + $0x40] ss:$28 sps:$4 sm:$0xff]   ;;  %v2831_v45 = vld [vmem:[%s3813_s1 + $0x108] sm:$0xff]  }
  0x10   :  { %2325 = vmatprep.subr.bf16.mxu0 %v2795_v16  ;;  %v2829_v44 = vld [vmem:[%s3812_s0 + $0x7c] ss:$28 sps:$4 sm:$0xff]   ;;  %v2827_v46 = vld [vmem:[%s3812_s0 + $0x70] ss:$28 sps:$4 sm:$0xff]   ;;  %v2835_v52 = vld [vmem:[%s3812_s0 + $0xa8] ss:$28 sps:$4 sm:$0xff]  }
  0x11   :  { %2436 = vmatpush3.bf16.msra.mxu1 %v2794_v15  ;;  %v2833_v47 = vld [vmem:[%s3812_s0 + $0xac] ss:$28 sps:$4 sm:$0xff]   ;;  %v2842_v48 = vld [vmem:[%s3813_s1 + $0x150] sm:$0xff]   ;;  %v2839_v53 = vld [vmem:[%s3812_s0 + $0xe4] ss:$28 sps:$4 sm:$0xff]  }
  0x12   :  { %2437 = vmatprep.subr.bf16.mxu1 %v2797_v18  ;;  %v2832_v49 = vld [vmem:[%s3812_s0 + $0x78] ss:$28 sps:$4 sm:$0xff]   ;;  %v2838_v55 = vld [vmem:[%s3812_s0 + $0xb0] ss:$28 sps:$4 sm:$0xff]   ;;  %v2841_v58 = vld [vmem:[%s3812_s0 + $0xe0] ss:$28 sps:$4 sm:$0xff]  }
  0x13   :  { %2326 = vmatpush3.bf16.msra.mxu0 %v2796_v17  ;;  %v2845_v50 = vld [vmem:[%s3813_s1 + $0x110] sm:$0xff]   ;;  %v2856_v54 = vld [vmem:[%s3813_s1 + $0x158] sm:$0xff]   ;;  %v2843_v57 = vld [vmem:[%s3812_s0 + $0xec] ss:$28 sps:$4 sm:$0xff]  }
  0x14   :  { %2327 = vmatprep.subr.bf16.mxu0 %v2799_v20  ;;  %v2836_v51 = vld [vmem:[%s3812_s0 + $0xb4] ss:$28 sps:$4 sm:$0xff]   ;;  %v2859_v56 = vld [vmem:[%s3813_s1 + $0x118] sm:$0xff]   ;;  %v2870_v59 = vld [vmem:[%s3813_s1 + $0x160] sm:$0xff]  }
  0x15   :  { %2438 = vmatpush3.bf16.msra.mxu1 %v2798_v19  ;;  %v2847_v60 = vld [vmem:[%s3812_s0 + $0x11c] ss:$28 sps:$4 sm:$0xff]   ;;  %v2846_v61 = vld [vmem:[%s3812_s0 + $0xe8] ss:$28 sps:$4 sm:$0xff]   ;;  %v2853_v3 = vld [vmem:[%s3812_s0 + $0x154] ss:$28 sps:$4 sm:$0xff]  }
  0x16   :  { %2439 = vmatprep.subr.bf16.mxu1 %v2801_v22  ;;  %v2873_v62 = vld [vmem:[%s3813_s1 + $0x120] sm:$0xff]   ;;  %v2849_v1 = vld [vmem:[%s3812_s0 + $0x118] ss:$28 sps:$4 sm:$0xff]   ;;  %v2885_v2 = vld [vmem:[%s3813_s1 + $0x168] sm:$0xff]  }
  0x17   :  { %2328 = vmatpush3.bf16.msra.mxu0 %v2800_v21  ;;  %v2875_v63 = vld [vmem:[%s3813_s1 + $0x180] sm:$0xff]   ;;  %v2888_v4 = vld [vmem:[%s3813_s1 + $0x128] sm:$0xff]   ;;  %v2857_v6 = vld [vmem:[%s3812_s0 + $0x15c] ss:$28 sps:$4 sm:$0xff]  }
  0x18   :  { %2329 = vmatprep.subr.bf16.mxu0 %v2803_v24  ;;  %v2850_v0 = vld [vmem:[%s3812_s0 + $0x124] ss:$28 sps:$4 sm:$0xff]   ;;  %v2855_v7 = vld [vmem:[%s3812_s0 + $0x150] ss:$28 sps:$4 sm:$0xff]   ;;  %v2860_v11 = vld [vmem:[%s3812_s0 + $0x158] ss:$28 sps:$4 sm:$0xff]  }
  0x19   :  { %2440 = vmatpush3.bf16.msra.mxu1 %v2802_v23  ;;  %v2852_v5 = vld [vmem:[%s3812_s0 + $0x120] ss:$28 sps:$4 sm:$0xff]   ;;  %v2899_v8 = vld [vmem:[%s3813_s1 + $0x170] sm:$0xff]   ;;  %v2861_v9 = vld [vmem:[%s3812_s0 + $0x18c] ss:$28 sps:$4 sm:$0xff]  }
  0x1a   :  { %2441 = vmatprep.subr.bf16.mxu1 %v2805_v26  ;;  %v2902_v10 = vld [vmem:[%s3813_s1 + $0x130] sm:$0xff]   ;;  %v2913_v13 = vld [vmem:[%s3813_s1 + $0x178] sm:$0xff]   ;;  %v2863_v14 = vld [vmem:[%s3812_s0 + $0x188] ss:$28 sps:$4 sm:$0xff]  }
  0x1b   :  { %2330 = vmatpush3.bf16.msra.mxu0 %v2804_v25  ;;  %v2864_v12 = vld [vmem:[%s3812_s0 + $0x194] ss:$28 sps:$4 sm:$0xff]   ;;  %v2867_v15 = vld [vmem:[%s3812_s0 + $0x1c4] ss:$28 sps:$4 sm:$0xff]   ;;  %v2916_v16 = vld [vmem:[%s3813_s1 + $0x138] sm:$0xff]  }
  0x1c   :  { %2331 = vmatprep.subr.bf16.mxu0 %v2807_v28  ;;  %v2866_v17 = vld [vmem:[%s3812_s0 + $0x190] ss:$28 sps:$4 sm:$0xff]   ;;  %v2869_v19 = vld [vmem:[%s3812_s0 + $0x1c0] ss:$28 sps:$4 sm:$0xff]   ;;  %v2874_v21 = vld [vmem:[%s3812_s0 + $0x1c8] ss:$28 sps:$4 sm:$0xff]  }
  0x1d   :  { %2442 = vmatpush3.bf16.msra.mxu1 %v2806_v27  ;;  %v2871_v18 = vld [vmem:[%s3812_s0 + $0x1cc] ss:$28 sps:$4 sm:$0xff]   ;;  %v2876_v20 = vld [vmem:[%s3812_s0 + $0x1fc] ss:$28 sps:$4 sm:$0xff]   ;;  %v2879_v22 = vld [vmem:[%s3812_s0 + $0x204] ss:$28 sps:$4 sm:$0xff]  }
  0x1e   :  { %2443 = vmatprep.subr.bf16.mxu1 %v2809_v30  ;;  %v2878_v23 = vld [vmem:[%s3812_s0 + $0x1f8] ss:$28 sps:$4 sm:$0xff]   ;;  %v2881_v25 = vld [vmem:[%s3812_s0 + $0x200] ss:$28 sps:$4 sm:$0xff]   ;;  %v2884_v27 = vld [vmem:[%s3812_s0 + $0x230] ss:$28 sps:$4 sm:$0xff]  }
  0x1f   :  { %2332 = vmatpush3.bf16.msra.mxu0 %v2808_v29  ;;  %v2882_v24 = vld [vmem:[%s3812_s0 + $0x234] ss:$28 sps:$4 sm:$0xff]   ;;  %v2886_v26 = vld [vmem:[%s3812_s0 + $0x23c] ss:$28 sps:$4 sm:$0xff]   ;;  %v2890_v28 = vld [vmem:[%s3812_s0 + $0x26c] ss:$28 sps:$4 sm:$0xff]  }
  0x20   :  { %2541 = vmatprep.subr.bf16.mxu0 %v2814_v34  ;;  %v2889_v29 = vld [vmem:[%s3812_s0 + $0x238] ss:$28 sps:$4 sm:$0xff]   ;;  %v2896_v32 = vld [vmem:[%s3812_s0 + $0x2a4] ss:$28 sps:$4 sm:$0xff]   ;;  %v2900_v34 = vld [vmem:[%s3812_s0 + $0x2ac] ss:$28 sps:$4 sm:$0xff]  }
  0x21   :  { %2444 = vmatpush3.bf16.msra.mxu1 %v2813_v33  ;;  %v2893_v30 = vld [vmem:[%s3812_s0 + $0x274] ss:$28 sps:$4 sm:$0xff]   ;;  %v2904_v36 = vld [vmem:[%s3812_s0 + $0x2dc] ss:$28 sps:$4 sm:$0xff]  }
  0x22   :  { %1191 = vmatmul.mubr.bf16.vlgmr.msra.gmra.mrb[0].mxu0 %v2810_v31  ;;  %2694 = vmatprep.subr.bf16.mxu1 %v2875_v63  ;;  %v2892_v31 = vld [vmem:[%s3812_s0 + $0x268] ss:$28 sps:$4 sm:$0xff]   ;;  %v2895_v33 = vld [vmem:[%s3812_s0 + $0x270] ss:$28 sps:$4 sm:$0xff]  }
  0x23   :  { %2542 = vmatpush3.bf16.msra.mxu0 %v2818_v37  ;;  %1198 = vmatprep.mubr.bf16.mxu0 %v2819_v38  ;;  %v2903_v37 = vld [vmem:[%s3812_s0 + $0x2a8] ss:$28 sps:$4 sm:$0xff]  }
  0x24   :  { %1352 = vmatmul.mubr.bf16.vlgmr.msra.gmra.mrb[0].mxu1 %v2815_v35  ;;  %2543 = vmatprep.subr.bf16.mxu0 %v2828_v42  ;;  %v2898_v35 = vld [vmem:[%s3812_s0 + $0x2a0] ss:$28 sps:$4 sm:$0xff]  }
  0x25   :  { %1359 = vmatprep.mubr.bf16.mxu1 %v2822_v39  ;;  %2695 = vmatpush3.bf16.msra.mxu1 %v2875_v63  ;;  %v2907_v38 = vld [vmem:[%s3812_s0 + $0x2e4] ss:$28 sps:$4 sm:$0xff]  }
  0x27   :  { %2544 = vmatpush3.bf16.msra.mxu0 %v2831_v45 }
  0x28   :  { %2545 = vmatprep.subr.bf16.mxu0 %v2842_v48 }
  0x2a   :  { %1199 = vmatmul.mubr.bf16.gmra.mrb[4].mxu0 %v2821_v40 }
  0x2b   :  { %1206 = vmatprep.mubr.bf16.mxu0 %v2825_v41  ;;  %2546 = vmatpush3.bf16.msra.mxu0 %v2845_v50 }
  0x2c   :  { %1360 = vmatmul.mubr.bf16.gmra.mrb[4].mxu1 %v2824_v43  ;;  %2547 = vmatprep.subr.bf16.mxu0 %v2856_v54 }
  0x2d   :  { %1367 = vmatprep.mubr.bf16.mxu1 %v2829_v44 }
  0x2f   :  { %2548 = vmatpush3.bf16.msra.mxu0 %v2859_v56 }
  0x30   :  { %2549 = vmatprep.subr.bf16.mxu0 %v2870_v59 }
  0x32   :  { %1207 = vmatmul.mubr.bf16.gmra.mrb[8].mxu0 %v2827_v46 }
  0x33   :  { %1214 = vmatprep.mubr.bf16.mxu0 %v2833_v47  ;;  %2550 = vmatpush3.bf16.msra.mxu0 %v2873_v62 }
  0x34   :  { %1368 = vmatmul.mubr.bf16.gmra.mrb[8].mxu1 %v2832_v49  ;;  %2551 = vmatprep.subr.bf16.mxu0 %v2885_v2 }
  0x35   :  { %1375 = vmatprep.mubr.bf16.mxu1 %v2836_v51 }
  0x37   :  { %2552 = vmatpush3.bf16.msra.mxu0 %v2888_v4 }
  0x38   :  { %2553 = vmatprep.subr.bf16.mxu0 %v2899_v8 }
  0x3a   :  { %1215 = vmatmul.mubr.bf16.gmra.mrb[12].mxu0 %v2835_v52 }
  0x3b   :  { %1222 = vmatprep.mubr.bf16.mxu0 %v2839_v53  ;;  %2554 = vmatpush3.bf16.msra.mxu0 %v2902_v10 }
  0x3c   :  { %1376 = vmatmul.mubr.bf16.gmra.mrb[12].mxu1 %v2838_v55  ;;  %2555 = vmatprep.subr.bf16.mxu0 %v2913_v13 }
  0x3d   :  { %1383 = vmatprep.mubr.bf16.mxu1 %v2843_v57 }
  0x3f   :  { %2556 = vmatpush3.bf16.msra.mxu0 %v2916_v16 }
  0x42   :  { %1223 = vmatmul.mubr.bf16.gmra.mrb[16].mxu0 %v2841_v58 }
  0x43   :  { %1230 = vmatprep.mubr.bf16.mxu0 %v2847_v60 }
  0x44   :  { %1384 = vmatmul.mubr.bf16.gmra.mrb[16].mxu1 %v2846_v61 }
  0x45   :  { %1391 = vmatprep.mubr.bf16.mxu1 %v2850_v0 }
  0x4a   :  { %1231 = vmatmul.mubr.bf16.gmra.mrb[20].mxu0 %v2849_v1 }
  0x4b   :  { %1238 = vmatprep.mubr.bf16.mxu0 %v2853_v3 }
  0x4c   :  { %1392 = vmatmul.mubr.bf16.gmra.mrb[20].mxu1 %v2852_v5 }
  0x4d   :  { %1399 = vmatprep.mubr.bf16.mxu1 %v2857_v6 }
  0x52   :  { %1239 = vmatmul.mubr.bf16.gmra.mrb[24].mxu0 %v2855_v7 }
  0x53   :  { %1246 = vmatprep.mubr.bf16.mxu0 %v2861_v9 }
  0x54   :  { %1400 = vmatmul.mubr.bf16.gmra.mrb[24].mxu1 %v2860_v11 }
  0x55   :  { %1407 = vmatprep.mubr.bf16.mxu1 %v2864_v12 }
  0x5a   :  { %1247 = vmatmul.mubr.bf16.gmra.mrb[28].mxu0 %v2863_v14 }
  0x5b   :  { %1254 = vmatprep.mubr.bf16.mxu0 %v2867_v15 }
  0x5c   :  { %1408 = vmatmul.mubr.bf16.gmra.mrb[28].mxu1 %v2866_v17 }
  0x5d   :  { %1415 = vmatprep.mubr.bf16.mxu1 %v2871_v18 }
  0x62   :  { %1255 = vmatmul.mubr.bf16.gmra.mrb[32].mxu0 %v2869_v19 }
  0x63   :  { %1262 = vmatprep.mubr.bf16.mxu0 %v2876_v20 }
  0x64   :  { %1416 = vmatmul.mubr.bf16.gmra.mrb[32].mxu1 %v2874_v21 }
  0x65   :  { %1423 = vmatprep.mubr.bf16.mxu1 %v2879_v22 }
  0x6a   :  { %1263 = vmatmul.mubr.bf16.gmra.mrb[36].mxu0 %v2878_v23 }
  0x6b   :  { %1270 = vmatprep.mubr.bf16.mxu0 %v2882_v24 }
  0x6c   :  { %1424 = vmatmul.mubr.bf16.gmra.mrb[36].mxu1 %v2881_v25 }
  0x6d   :  { %1431 = vmatprep.mubr.bf16.mxu1 %v2886_v26 }
  0x72   :  { %1271 = vmatmul.mubr.bf16.gmra.mrb[40].mxu0 %v2884_v27 }
  0x73   :  { %1278 = vmatprep.mubr.bf16.mxu0 %v2890_v28 }
  0x74   :  { %1432 = vmatmul.mubr.bf16.gmra.mrb[40].mxu1 %v2889_v29 }
  0x75   :  { %1439 = vmatprep.mubr.bf16.mxu1 %v2893_v30 }
  0x7a   :  { %1279 = vmatmul.mubr.bf16.gmra.mrb[44].mxu0 %v2892_v31 }
  0x7b   :  { %1286 = vmatprep.mubr.bf16.mxu0 %v2896_v32 }
  0x7c   :  { %1440 = vmatmul.mubr.bf16.gmra.mrb[44].mxu1 %v2895_v33 }
  0x7d   :  { %1447 = vmatprep.mubr.bf16.mxu1 %v2900_v34 }
  0x82   :  { %1287 = vmatmul.mubr.bf16.gmra.mrb[48].mxu0 %v2898_v35 }
  0x83   :  { %10 = vsyncpa [#allocation3], 0  ;;  %1294 = vmatprep.mubr.bf16.mxu0 %v2904_v36  ;;  %v2906_v39 = vld [vmem:[%s3812_s0 + $0x2d8] ss:$28 sps:$4 sm:$0xff]   ;;  %v2909_v41 = vld [vmem:[%s3812_s0 + $0x2e0] ss:$28 sps:$4 sm:$0xff]  }
  0x84   :  { %1448 = vmatmul.mubr.bf16.gmra.mrb[48].mxu1 %v2903_v37  ;;  %v2910_v40 = vld [vmem:[%s3812_s0 + $0x314] ss:$28 sps:$4 sm:$0xff]   ;;  %v2914_v42 = vld [vmem:[%s3812_s0 + $0x31c] ss:$28 sps:$4 sm:$0xff]   ;;  %v2918_v44 = vld [vmem:[%s3812_s0 + $0x34c] ss:$28 sps:$4 sm:$0xff]  }
  0x85   :  { %1455 = vmatprep.mubr.bf16.mxu1 %v2907_v38  ;;  %v2912_v43 = vld [vmem:[%s3812_s0 + $0x310] ss:$28 sps:$4 sm:$0xff]   ;;  %v2917_v45 = vld [vmem:[%s3812_s0 + $0x318] ss:$28 sps:$4 sm:$0xff]   ;;  %v2920_v47 = vld [vmem:[%s3812_s0 + $0x348] ss:$28 sps:$4 sm:$0xff]  }
  0x86   :  { %v2921_v46 = vld [vmem:[%s3812_s0 + $0x354] ss:$28 sps:$4 sm:$0xff]   ;;  %vm1109_vm0 = vcmask 130048   ;;  %v2929_v52 = vld [vmem:[%s3812_s0 + $0x4c] ss:$28 sps:$4 sm:$0xff]   ;;  %v2988_v22 = vld [vmem:[%s3815_s3] sm:$0xff]  }
  0x87   :  { %v2926_v48 = vld [vmem:[%s3812_s0 + $0x14] ss:$28 sps:$4 sm:$0xff]   ;;  %v2935_v54 = vld [vmem:[%s3812_s0 + $0x88] ss:$28 sps:$4 sm:$0xff]   ;;  %v2936_v57 = vld [vmem:[%s3812_s0 + $0xc0] ss:$28 sps:$4 sm:$0xff]   ;;  %2728 = vmatprep.subr.bf16.mxu1 %v2988_v22 }
  0x88   :  { %v2923_v49 = vld [vmem:[%s3812_s0 + $0x350] ss:$28 sps:$4 sm:$0xff]   ;;  %v2927_v50 = vld [vmem:[%s3812_s0 + $0x18] ss:$28 sps:$4 sm:$0xff]   ;;  %v2931_v55 = vld [vmem:[%s3812_s0 + $0x48] ss:$28 sps:$4 sm:$0xff]  }
  0x89   :  { %v2924_v51 = vld [vmem:[%s3812_s0 + $0x10] ss:$28 sps:$4 sm:$0xff]   ;;  %v2932_v56 = vld [vmem:[%s3812_s0 + $0x84] ss:$28 sps:$4 sm:$0xff]   ;;  %v2943_v58 = vld [vmem:[%s3812_s0 + $0xf8] ss:$28 sps:$4 sm:$0xff]  }
  0x8a   :  { %1295 = vmatmul.mubr.bf16.gmra.mrb[52].mxu0 %v2906_v39  ;;  %v2928_v53 = vld [vmem:[%s3812_s0 + $0x50] ss:$28 sps:$4 sm:$0xff]   ;;  %v2934_v59 = vld [vmem:[%s3812_s0 + $0x80] ss:$28 sps:$4 sm:$0xff]   ;;  %v2951_v62 = vld [vmem:[%s3812_s0 + $0x168] ss:$28 sps:$4 sm:$0xff]  }
  0x8b   :  { %1302 = vmatprep.mubr.bf16.mxu0 %v2910_v40  ;;  %v2937_v60 = vld [vmem:[%s3812_s0 + $0xbc] ss:$28 sps:$4 sm:$0xff]   ;;  %v2944_v61 = vld [vmem:[%s3812_s0 + $0x130] ss:$28 sps:$4 sm:$0xff]   ;;  %v2967_v6 = vld [vmem:[%s3812_s0 + $0x248] ss:$28 sps:$4 sm:$0xff]  }
  0x8c   :  { %1456 = vmatmul.mubr.bf16.gmra.mrb[52].mxu1 %v2909_v41  ;;  %v2939_v63 = vld [vmem:[%s3812_s0 + $0xb8] ss:$28 sps:$4 sm:$0xff]   ;;  %v2952_v1 = vld [vmem:[%s3812_s0 + $0x1a0] ss:$28 sps:$4 sm:$0xff]   ;;  %v2942_v3 = vld [vmem:[%s3812_s0 + $0xf0] ss:$28 sps:$4 sm:$0xff]  }
  0x8d   :  { %1463 = vmatprep.mubr.bf16.mxu1 %v2914_v42  ;;  %v2940_v0 = vld [vmem:[%s3812_s0 + $0xf4] ss:$28 sps:$4 sm:$0xff]   ;;  %v2945_v4 = vld [vmem:[%s3812_s0 + $0x12c] ss:$28 sps:$4 sm:$0xff]   ;;  %v2948_v8 = vld [vmem:[%s3812_s0 + $0x164] ss:$28 sps:$4 sm:$0xff]  }
  0x8e   :  { %v2959_v2 = vld [vmem:[%s3812_s0 + $0x1d8] ss:$28 sps:$4 sm:$0xff]   ;;  %v2960_v5 = vld [vmem:[%s3812_s0 + $0x210] ss:$28 sps:$4 sm:$0xff]   ;;  %v2947_v7 = vld [vmem:[%s3812_s0 + $0x128] ss:$28 sps:$4 sm:$0xff]  }
  0x8f   :  { %v2968_v9 = vld [vmem:[%s3812_s0 + $0x280] ss:$28 sps:$4 sm:$0xff]   ;;  %v2975_v10 = vld [vmem:[%s3812_s0 + $0x2b8] ss:$28 sps:$4 sm:$0xff]   ;;  %v2976_v13 = vld [vmem:[%s3812_s0 + $0x2f0] ss:$28 sps:$4 sm:$0xff]  }
  0x90   :  { %v2950_v11 = vld [vmem:[%s3812_s0 + $0x160] ss:$28 sps:$4 sm:$0xff]   ;;  %v2983_v14 = vld [vmem:[%s3812_s0 + $0x328] ss:$28 sps:$4 sm:$0xff]   ;;  %v2955_v15 = vld [vmem:[%s3812_s0 + $0x198] ss:$28 sps:$4 sm:$0xff]  }
  0x91   :  { %v2953_v12 = vld [vmem:[%s3812_s0 + $0x19c] ss:$28 sps:$4 sm:$0xff]   ;;  %v2956_v16 = vld [vmem:[%s3812_s0 + $0x1d4] ss:$28 sps:$4 sm:$0xff]   ;;  %v2961_v19 = vld [vmem:[%s3812_s0 + $0x20c] ss:$28 sps:$4 sm:$0xff]  }
  0x92   :  { %1303 = vmatmul.mubr.bf16.gmra.mrb[56].mxu0 %v2912_v43  ;;  %v2984_v17 = vld [vmem:[%s3812_s0 + $0x360] ss:$28 sps:$4 sm:$0xff]   ;;  %v2958_v18 = vld [vmem:[%s3812_s0 + $0x1d0] ss:$28 sps:$4 sm:$0xff]   ;;  %v2963_v20 = vld [vmem:[%s3812_s0 + $0x208] ss:$28 sps:$4 sm:$0xff]  }
  0x93   :  { %1310 = vmatprep.mubr.bf16.mxu0 %v2918_v44  ;;  %v2964_v21 = vld [vmem:[%s3812_s0 + $0x244] ss:$28 sps:$4 sm:$0xff]   ;;  %v2989_v24 = vld [vmem:[%s3815_s3 + $0x8] sm:$0xff]   ;;  %v2969_v25 = vld [vmem:[%s3812_s0 + $0x27c] ss:$28 sps:$4 sm:$0xff]  }
  0x94   :  { %1464 = vmatmul.mubr.bf16.gmra.mrb[56].mxu1 %v2917_v45  ;;  %v2966_v23 = vld [vmem:[%s3812_s0 + $0x240] ss:$28 sps:$4 sm:$0xff]   ;;  %v2990_v26 = vld [vmem:[%s3815_s3 + $0x10] sm:$0xff]  }
  0x95   :  { %1471 = vmatprep.mubr.bf16.mxu1 %v2921_v46  ;;  %v3537_v28 = vld [vmem:[%s3814_s2] ss:$0 sm:$0xff]  ;;  %v2971_v30 = vld [vmem:[%s3812_s0 + $0x278] ss:$28 sps:$4 sm:$0xff]  }
  0x96   :  { %v2991_v31 = vld [vmem:[%s3815_s3 + $0x18] sm:$0xff]   ;;  %v2972_v34 = vld [vmem:[%s3812_s0 + $0x2b4] ss:$28 sps:$4 sm:$0xff]   ;;  %v2992_v42 = vld [vmem:[%s3815_s3 + $0x20] sm:$0xff]  }
  0x9a   :  { %1311 = vmatmul.mubr.bf16.gmra.mrb[60].mxu0 %v2920_v47 }
  0x9b   :  { %1512 = vmatprep.mubr.bf16.mxu0 %v2926_v48 }
  0x9c   :  { %1472 = vmatmul.mubr.bf16.gmra.mrb[60].mxu1 %v2923_v49 }
  0x9d   :  { %2696 = vmatprep.mubr.msk.bf16.mxu1 %vm1109_vm0, %v2927_v50  ;;  %v2974_v50 = vld [vmem:[%s3812_s0 + $0x2b0] ss:$28 sps:$4 sm:$0xff]  }
  0xa2   :  { %1513 = vmatmul.mubr.bf16.vlgmr.msra.gmra.mrb[64].mxu0 %v2924_v51  ;;  %v2993_v51 = vld [vmem:[%s3815_s3 + $0x28] sm:$0xff]  }
  0xa3   :  { %1520 = vmatprep.mubr.bf16.mxu0 %v2929_v52 }
  0xa4   :  { %2697 = vmatmul.mubr.msk.bf16.vlgmr.msra.gmra.mrb[64].mxu1 %vm1109_vm0, %v2928_v53 }
  0xa5   :  { %2700 = vmatprep.mubr.msk.bf16.mxu1 %vm1109_vm0, %v2935_v54  ;;  %2729 = vmatpush3.bf16.msra.mxu1 %v2988_v22  ;;  %v2977_v54 = vld [vmem:[%s3812_s0 + $0x2ec] ss:$28 sps:$4 sm:$0xff]  }
  0xa6   :  { %2730 = vmatprep.subr.bf16.mxu1 %v2989_v24 }
  0xa9   :  { %2731 = vmatpush3.bf16.msra.mxu1 %v2989_v24 }
  0xaa   :  { %1521 = vmatmul.mubr.bf16.gmra.mrb[68].mxu0 %v2931_v55  ;;  %2732 = vmatprep.subr.bf16.mxu1 %v2990_v26 }
  0xab   :  { %1528 = vmatprep.mubr.bf16.mxu0 %v2932_v56 }
  0xac   :  { %2701 = vmatmul.mubr.msk.bf16.gmra.mrb[68].mxu1 %vm1109_vm0, %v2936_v57 }
  0xad   :  { %2704 = vmatprep.mubr.msk.bf16.mxu1 %vm1109_vm0, %v2943_v58  ;;  %2733 = vmatpush3.bf16.msra.mxu1 %v2990_v26 }
  0xae   :  { %2734 = vmatprep.subr.bf16.mxu1 %v2991_v31 }
  0xb1   :  { %2735 = vmatpush3.bf16.msra.mxu1 %v2991_v31 }
  0xb2   :  { %1529 = vmatmul.mubr.bf16.gmra.mrb[72].mxu0 %v2934_v59  ;;  %2736 = vmatprep.subr.bf16.mxu1 %v2992_v42 }
  0xb3   :  { %1536 = vmatprep.mubr.bf16.mxu0 %v2937_v60 }
  0xb4   :  { %2705 = vmatmul.mubr.msk.bf16.gmra.mrb[72].mxu1 %vm1109_vm0, %v2944_v61 }
  0xb5   :  { %2708 = vmatprep.mubr.msk.bf16.mxu1 %vm1109_vm0, %v2951_v62  ;;  %2737 = vmatpush3.bf16.msra.mxu1 %v2992_v42  ;;  %v2994_v62 = vld [vmem:[%s3815_s3 + $0x30] sm:$0xff]  }
  0xb6   :  { %2738 = vmatprep.subr.bf16.mxu1 %v2993_v51 }
  0xb9   :  { %2739 = vmatpush3.bf16.msra.mxu1 %v2993_v51 }
  0xba   :  { %1537 = vmatmul.mubr.bf16.gmra.mrb[76].mxu0 %v2939_v63  ;;  %2740 = vmatprep.subr.bf16.mxu1 %v2994_v62 }
  0xbb   :  { %1544 = vmatprep.mubr.bf16.mxu0 %v2940_v0 }
  0xbc   :  { %2709 = vmatmul.mubr.msk.bf16.gmra.mrb[76].mxu1 %vm1109_vm0, %v2952_v1 }
  0xbd   :  { %2712 = vmatprep.mubr.msk.bf16.mxu1 %vm1109_vm0, %v2959_v2  ;;  %2741 = vmatpush3.bf16.msra.mxu1 %v2994_v62 }
  0xc2   :  { %1545 = vmatmul.mubr.bf16.gmra.mrb[80].mxu0 %v2942_v3 }
  0xc3   :  { %1552 = vmatprep.mubr.bf16.mxu0 %v2945_v4 }
  0xc4   :  { %2713 = vmatmul.mubr.msk.bf16.gmra.mrb[80].mxu1 %vm1109_vm0, %v2960_v5 }
  0xc5   :  { %2716 = vmatprep.mubr.msk.bf16.mxu1 %vm1109_vm0, %v2967_v6  ;;  %v2979_v6 = vld [vmem:[%s3812_s0 + $0x2e8] ss:$28 sps:$4 sm:$0xff]  }
  0xca   :  { %1553 = vmatmul.mubr.bf16.gmra.mrb[84].mxu0 %v2947_v7  ;;  %v2995_v7 = vld [vmem:[%s3815_s3 + $0x38] sm:$0xff]  }
  0xcb   :  { %1560 = vmatprep.mubr.bf16.mxu0 %v2948_v8  ;;  %2742 = vmatprep.subr.bf16.mxu1 %v2995_v7 }
  0xcc   :  { %2717 = vmatmul.mubr.msk.bf16.gmra.mrb[84].mxu1 %vm1109_vm0, %v2968_v9 }
  0xcd   :  { %2720 = vmatprep.mubr.msk.bf16.mxu1 %vm1109_vm0, %v2975_v10  ;;  %v2980_v10 = vld [vmem:[%s3812_s0 + $0x324] ss:$28 sps:$4 sm:$0xff]   ;;  %2743 = vmatpush3.bf16.msra.mxu1 %v2995_v7 }
  0xd2   :  { %1561 = vmatmul.mubr.bf16.gmra.mrb[88].mxu0 %v2950_v11 }
  0xd3   :  { %1568 = vmatprep.mubr.bf16.mxu0 %v2953_v12 }
  0xd4   :  { %2721 = vmatmul.mubr.msk.bf16.gmra.mrb[88].mxu1 %vm1109_vm0, %v2976_v13 }
  0xd5   :  { %2724 = vmatprep.mubr.msk.bf16.mxu1 %vm1109_vm0, %v2983_v14 }
  0xda   :  { %1569 = vmatmul.mubr.bf16.gmra.mrb[92].mxu0 %v2955_v15 }
  0xdb   :  { %1576 = vmatprep.mubr.bf16.mxu0 %v2956_v16 }
  0xdc   :  { %2725 = vmatmul.mubr.msk.bf16.gmra.mrb[92].mxu1 %vm1109_vm0, %v2984_v17 }
  0xe2   :  { %1577 = vmatmul.mubr.bf16.gmra.mrb[96].mxu0 %v2958_v18 }
  0xe3   :  { %1584 = vmatprep.mubr.bf16.mxu0 %v2961_v19 }
  0xea   :  { %1585 = vmatmul.mubr.bf16.gmra.mrb[100].mxu0 %v2963_v20 }
  0xeb   :  { %1592 = vmatprep.mubr.bf16.mxu0 %v2964_v21 }
  0xf2   :  { %1593 = vmatmul.mubr.bf16.gmra.mrb[104].mxu0 %v2966_v23 }
  0xf3   :  { %1600 = vmatprep.mubr.bf16.mxu0 %v2969_v25  ;;  %v2982_v25 = vld [vmem:[%s3812_s0 + $0x320] ss:$28 sps:$4 sm:$0xff]  }
  0xf5   :  { %v2333_v27 = vpop.f32.mrb[0].mxu0 }
  0xf6   :  { %v2334_v29 = vpop.f32.mrb[1].mxu0 }
  0xf7   :  { %v2335_v32 = vadd.f32 %v2334_v29, %v2333_v27  ;;  %v2336_v33 = vpop.f32.mrb[2].mxu0  ;;  %v2445_v35 = vpop.f32.mrb[0].mxu1  ;;  %v2985_v29 = vld [vmem:[%s3812_s0 + $0x35c] ss:$28 sps:$4 sm:$0xff]  }
  0xf8   :  { %v2337_v36 = vpop.f32.mrb[3].mxu0  ;;  %v2446_v39 = vpop.f32.mrb[1].mxu1 }
  0xf9   :  { %v1193_v37 = vadd.f32 %v2335_v32, %v3537_v28  ;;  %v2338_v38 = vadd.f32 %v2337_v36, %v2336_v33  ;;  %v2447_v40 = vadd.f32 %v2446_v39, %v2445_v35  ;;  %v2448_v41 = vpop.f32.mrb[2].mxu1 }
  0xfa   :  { %1601 = vmatmul.mubr.bf16.gmra.mrb[108].mxu0 %v2971_v30  ;;  %v2449_v44 = vpop.f32.mrb[3].mxu1 }
  0xfb   :  { %v1196_v43 = vadd.f32 %v2338_v38, %v3537_v28  ;;  %1608 = vmatprep.mubr.bf16.mxu0 %v2972_v34  ;;  %v3553_v45 = vadd.f32 %v2447_v40, %v1193_v37  ;;  %v2450_v46 = vadd.f32 %v2449_v44, %v2448_v41  ;;  %v2987_v44 = vld [vmem:[%s3812_s0 + $0x358] ss:$28 sps:$4 sm:$0xff]  }
  0xfd   :  { %v2339_v47 = vpop.f32.mrb[4].mxu0  ;;  %v3555_v48 = vadd.f32 %v2450_v46, %v1196_v43 }
  0xfe   :  { %v2340_v49 = vpop.f32.mrb[5].mxu0 }
  0xff   :  { %v2341_v52 = vadd.f32 %v2340_v49, %v2339_v47  ;;  %v2342_v53 = vpop.f32.mrb[6].mxu0  ;;  %v2451_v55 = vpop.f32.mrb[4].mxu1 }
 0x100   :  { %v2343_v56 = vpop.f32.mrb[7].mxu0  ;;  %v2452_v59 = vpop.f32.mrb[5].mxu1 }
 0x101   :  { %v1201_v57 = vadd.f32 %v2341_v52, %v3537_v28  ;;  %v2344_v58 = vadd.f32 %v2343_v56, %v2342_v53  ;;  %v2453_v60 = vadd.f32 %v2452_v59, %v2451_v55  ;;  %v2454_v61 = vpop.f32.mrb[6].mxu1 }
 0x102   :  { %1609 = vmatmul.mubr.bf16.gmra.mrb[112].mxu0 %v2974_v50  ;;  %v2455_v0 = vpop.f32.mrb[7].mxu1 }
 0x103   :  { %v1204_v63 = vadd.f32 %v2344_v58, %v3537_v28  ;;  %1616 = vmatprep.mubr.bf16.mxu0 %v2977_v54  ;;  %v3571_v1 = vadd.f32 %v2453_v60, %v1201_v57  ;;  %v2456_v2 = vadd.f32 %v2455_v0, %v2454_v61 }
 0x105   :  { %v2345_v3 = vpop.f32.mrb[8].mxu0  ;;  %v3573_v4 = vadd.f32 %v2456_v2, %v1204_v63 }
 0x106   :  { %v2346_v5 = vpop.f32.mrb[9].mxu0 }
 0x107   :  { %v2347_v8 = vadd.f32 %v2346_v5, %v2345_v3  ;;  %v2348_v9 = vpop.f32.mrb[10].mxu0  ;;  %v2457_v11 = vpop.f32.mrb[8].mxu1 }
 0x108   :  { %v2349_v12 = vpop.f32.mrb[11].mxu0  ;;  %v2458_v15 = vpop.f32.mrb[9].mxu1 }
 0x109   :  { %v1209_v13 = vadd.f32 %v2347_v8, %v3537_v28  ;;  %v2350_v14 = vadd.f32 %v2349_v12, %v2348_v9  ;;  %v2459_v16 = vadd.f32 %v2458_v15, %v2457_v11  ;;  %v2460_v17 = vpop.f32.mrb[10].mxu1 }
 0x10a   :  { %1617 = vmatmul.mubr.bf16.gmra.mrb[116].mxu0 %v2979_v6  ;;  %v2461_v19 = vpop.f32.mrb[11].mxu1 }
 0x10b   :  { %v1212_v18 = vadd.f32 %v2350_v14, %v3537_v28  ;;  %1624 = vmatprep.mubr.bf16.mxu0 %v2980_v10  ;;  %v3586_v20 = vadd.f32 %v2459_v16, %v1209_v13  ;;  %v2462_v21 = vadd.f32 %v2461_v19, %v2460_v17 }
 0x10d   :  { %v2351_v22 = vpop.f32.mrb[12].mxu0  ;;  %v3588_v23 = vadd.f32 %v2462_v21, %v1212_v18 }
 0x10e   :  { %v2352_v24 = vpop.f32.mrb[13].mxu0 }
 0x10f   :  { %v2353_v26 = vadd.f32 %v2352_v24, %v2351_v22  ;;  %v2354_v27 = vpop.f32.mrb[14].mxu0  ;;  %v2463_v30 = vpop.f32.mrb[12].mxu1 }
 0x110   :  { %v2355_v31 = vpop.f32.mrb[15].mxu0  ;;  %v2464_v34 = vpop.f32.mrb[13].mxu1 }
 0x111   :  { %v1217_v32 = vadd.f32 %v2353_v26, %v3537_v28  ;;  %v2356_v33 = vadd.f32 %v2355_v31, %v2354_v27  ;;  %v2465_v35 = vadd.f32 %v2464_v34, %v2463_v30  ;;  %v2466_v36 = vpop.f32.mrb[14].mxu1 }
 0x112   :  { %1625 = vmatmul.mubr.bf16.gmra.mrb[120].mxu0 %v2982_v25  ;;  %v2467_v38 = vpop.f32.mrb[15].mxu1 }
 0x113   :  { %v1220_v37 = vadd.f32 %v2356_v33, %v3537_v28  ;;  %1632 = vmatprep.mubr.bf16.mxu0 %v2985_v29  ;;  %v3598_v39 = vadd.f32 %v2465_v35, %v1217_v32  ;;  %v2468_v40 = vadd.f32 %v2467_v38, %v2466_v36 }
 0x115   :  { %v2357_v41 = vpop.f32.mrb[16].mxu0  ;;  %v3600_v42 = vadd.f32 %v2468_v40, %v1220_v37 }
 0x116   :  { %v2358_v43 = vpop.f32.mrb[17].mxu0 }
 0x117   :  { %v2359_v46 = vadd.f32 %v2358_v43, %v2357_v41  ;;  %v2360_v47 = vpop.f32.mrb[18].mxu0  ;;  %v2469_v49 = vpop.f32.mrb[16].mxu1 }
 0x118   :  { %v2361_v50 = vpop.f32.mrb[19].mxu0  ;;  %v2470_v53 = vpop.f32.mrb[17].mxu1 }
 0x119   :  { %v1225_v51 = vadd.f32 %v2359_v46, %v3537_v28  ;;  %v2362_v52 = vadd.f32 %v2361_v50, %v2360_v47  ;;  %v2471_v54 = vadd.f32 %v2470_v53, %v2469_v49  ;;  %v2472_v55 = vpop.f32.mrb[18].mxu1 }
 0x11a   :  { %1633 = vmatmul.mubr.bf16.gmra.mrb[124].mxu0 %v2987_v44  ;;  %v2473_v57 = vpop.f32.mrb[19].mxu1 }
 0x11b   :  { %v1228_v56 = vadd.f32 %v2362_v52, %v3537_v28  ;;  %v3607_v58 = vadd.f32 %v2471_v54, %v1225_v51  ;;  %v2474_v59 = vadd.f32 %v2473_v57, %v2472_v55 }
 0x11d   :  { %v2363_v60 = vpop.f32.mrb[20].mxu0  ;;  %v3609_v61 = vadd.f32 %v2474_v59, %v1228_v56 }
 0x11e   :  { %v2364_v62 = vpop.f32.mrb[21].mxu0 }
 0x11f   :  { %v2365_v63 = vadd.f32 %v2364_v62, %v2363_v60  ;;  %v2366_v0 = vpop.f32.mrb[22].mxu0  ;;  %v2475_v2 = vpop.f32.mrb[20].mxu1 }
 0x120   :  { %v2367_v3 = vpop.f32.mrb[23].mxu0  ;;  %v2476_v7 = vpop.f32.mrb[21].mxu1 }
 0x121   :  { %v1233_v5 = vadd.f32 %v2365_v63, %v3537_v28  ;;  %v2368_v6 = vadd.f32 %v2367_v3, %v2366_v0  ;;  %v2477_v8 = vadd.f32 %v2476_v7, %v2475_v2  ;;  %v2478_v9 = vpop.f32.mrb[22].mxu1 }
 0x122   :  { %v2479_v11 = vpop.f32.mrb[23].mxu1 }
 0x123   :  { %v1236_v10 = vadd.f32 %v2368_v6, %v3537_v28  ;;  %v3613_v12 = vadd.f32 %v2477_v8, %v1233_v5  ;;  %v2480_v13 = vadd.f32 %v2479_v11, %v2478_v9 }
 0x125   :  { %v2369_v14 = vpop.f32.mrb[24].mxu0  ;;  %v3615_v15 = vadd.f32 %v2480_v13, %v1236_v10 }
 0x126   :  { %v2370_v16 = vpop.f32.mrb[25].mxu0 }
 0x127   :  { %v2371_v17 = vadd.f32 %v2370_v16, %v2369_v14  ;;  %v2372_v18 = vpop.f32.mrb[26].mxu0  ;;  %v2481_v19 = vpop.f32.mrb[24].mxu1 }
 0x128   :  { %v2373_v21 = vpop.f32.mrb[27].mxu0  ;;  %v2482_v25 = vpop.f32.mrb[25].mxu1 }
 0x129   :  { %v1241_v22 = vadd.f32 %v2371_v17, %v3537_v28  ;;  %v2374_v24 = vadd.f32 %v2373_v21, %v2372_v18  ;;  %v2483_v26 = vadd.f32 %v2482_v25, %v2481_v19  ;;  %v2484_v27 = vpop.f32.mrb[26].mxu1 }
 0x12a   :  { %v2485_v30 = vpop.f32.mrb[27].mxu1 }
 0x12b   :  { %v1244_v29 = vadd.f32 %v2374_v24, %v3537_v28  ;;  %v3619_v31 = vadd.f32 %v2483_v26, %v1241_v22  ;;  %v2486_v32 = vadd.f32 %v2485_v30, %v2484_v27 }
 0x12d   :  { %v2375_v33 = vpop.f32.mrb[28].mxu0  ;;  %v3621_v34 = vadd.f32 %v2486_v32, %v1244_v29 }
 0x12e   :  { %v2376_v35 = vpop.f32.mrb[29].mxu0 }
 0x12f   :  { %v2377_v36 = vadd.f32 %v2376_v35, %v2375_v33  ;;  %v2378_v37 = vpop.f32.mrb[30].mxu0  ;;  %v2487_v38 = vpop.f32.mrb[28].mxu1 }
 0x130   :  { %v2379_v40 = vpop.f32.mrb[31].mxu0  ;;  %v2488_v44 = vpop.f32.mrb[29].mxu1 }
 0x131   :  { %v1249_v41 = vadd.f32 %v2377_v36, %v3537_v28  ;;  %v2380_v43 = vadd.f32 %v2379_v40, %v2378_v37  ;;  %v2489_v46 = vadd.f32 %v2488_v44, %v2487_v38  ;;  %v2490_v47 = vpop.f32.mrb[30].mxu1 }
 0x132   :  { %v2491_v50 = vpop.f32.mrb[31].mxu1 }
 0x133   :  { %v1252_v49 = vadd.f32 %v2380_v43, %v3537_v28  ;;  %v3625_v51 = vadd.f32 %v2489_v46, %v1249_v41  ;;  %v2492_v52 = vadd.f32 %v2491_v50, %v2490_v47 }
 0x135   :  { %v2381_v53 = vpop.f32.mrb[32].mxu0  ;;  %v3627_v54 = vadd.f32 %v2492_v52, %v1252_v49 }
 0x136   :  { %v2382_v55 = vpop.f32.mrb[33].mxu0 }
 0x137   :  { %v2383_v56 = vadd.f32 %v2382_v55, %v2381_v53  ;;  %v2384_v57 = vpop.f32.mrb[34].mxu0  ;;  %v2493_v59 = vpop.f32.mrb[32].mxu1 }
 0x138   :  { %v2385_v60 = vpop.f32.mrb[35].mxu0  ;;  %v2494_v0 = vpop.f32.mrb[33].mxu1 }
 0x139   :  { %v1257_v62 = vadd.f32 %v2383_v56, %v3537_v28  ;;  %v2386_v63 = vadd.f32 %v2385_v60, %v2384_v57  ;;  %v2495_v2 = vadd.f32 %v2494_v0, %v2493_v59  ;;  %v2496_v3 = vpop.f32.mrb[34].mxu1 }
 0x13a   :  { %v2497_v6 = vpop.f32.mrb[35].mxu1 }
 0x13b   :  { %v1260_v5 = vadd.f32 %v2386_v63, %v3537_v28  ;;  %v3631_v7 = vadd.f32 %v2495_v2, %v1257_v62  ;;  %v2498_v8 = vadd.f32 %v2497_v6, %v2496_v3 }
 0x13d   :  { %v2387_v9 = vpop.f32.mrb[36].mxu0  ;;  %v3633_v10 = vadd.f32 %v2498_v8, %v1260_v5 }
 0x13e   :  { %v2388_v11 = vpop.f32.mrb[37].mxu0 }
 0x13f   :  { %v2389_v13 = vadd.f32 %v2388_v11, %v2387_v9  ;;  %v2390_v14 = vpop.f32.mrb[38].mxu0  ;;  %v2499_v16 = vpop.f32.mrb[36].mxu1 }
 0x140   :  { %v2391_v17 = vpop.f32.mrb[39].mxu0  ;;  %v2500_v21 = vpop.f32.mrb[37].mxu1 }
 0x141   :  { %v1265_v18 = vadd.f32 %v2389_v13, %v3537_v28  ;;  %v2392_v19 = vadd.f32 %v2391_v17, %v2390_v14  ;;  %v2501_v22 = vadd.f32 %v2500_v21, %v2499_v16  ;;  %v2502_v24 = vpop.f32.mrb[38].mxu1 }
 0x142   :  { %v2503_v26 = vpop.f32.mrb[39].mxu1 }
 0x143   :  { %v1268_v25 = vadd.f32 %v2392_v19, %v3537_v28  ;;  %v3637_v27 = vadd.f32 %v2501_v22, %v1265_v18  ;;  %v2504_v29 = vadd.f32 %v2503_v26, %v2502_v24 }
 0x145   :  { %v2393_v30 = vpop.f32.mrb[40].mxu0  ;;  %v3639_v32 = vadd.f32 %v2504_v29, %v1268_v25 }
 0x146   :  { %v2394_v33 = vpop.f32.mrb[41].mxu0 }
 0x147   :  { %v2395_v35 = vadd.f32 %v2394_v33, %v2393_v30  ;;  %v2396_v36 = vpop.f32.mrb[42].mxu0  ;;  %v2505_v37 = vpop.f32.mrb[40].mxu1 }
 0x148   :  { %v2397_v38 = vpop.f32.mrb[43].mxu0  ;;  %v2506_v43 = vpop.f32.mrb[41].mxu1 }
 0x149   :  { %v1273_v40 = vadd.f32 %v2395_v35, %v3537_v28  ;;  %v2398_v41 = vadd.f32 %v2397_v38, %v2396_v36  ;;  %v2507_v44 = vadd.f32 %v2506_v43, %v2505_v37  ;;  %v2508_v46 = vpop.f32.mrb[42].mxu1 }
 0x14a   :  { %v2509_v49 = vpop.f32.mrb[43].mxu1 }
 0x14b   :  { %v1276_v47 = vadd.f32 %v2398_v41, %v3537_v28  ;;  %v3643_v50 = vadd.f32 %v2507_v44, %v1273_v40  ;;  %v2510_v52 = vadd.f32 %v2509_v49, %v2508_v46 }
 0x14d   :  { %v2399_v53 = vpop.f32.mrb[44].mxu0  ;;  %v3645_v55 = vadd.f32 %v2510_v52, %v1276_v47 }
 0x14e   :  { %v2400_v56 = vpop.f32.mrb[45].mxu0 }
 0x14f   :  { %v2401_v57 = vadd.f32 %v2400_v56, %v2399_v53  ;;  %v2402_v59 = vpop.f32.mrb[46].mxu0  ;;  %v2511_v60 = vpop.f32.mrb[44].mxu1 }
 0x150   :  { %v2403_v62 = vpop.f32.mrb[47].mxu0  ;;  %v2512_v2 = vpop.f32.mrb[45].mxu1 }
 0x151   :  { %v1281_v63 = vadd.f32 %v2401_v57, %v3537_v28  ;;  %v2404_v0 = vadd.f32 %v2403_v62, %v2402_v59  ;;  %v2513_v3 = vadd.f32 %v2512_v2, %v2511_v60  ;;  %v2514_v5 = vpop.f32.mrb[46].mxu1 }
 0x152   :  { %v2515_v8 = vpop.f32.mrb[47].mxu1 }
 0x153   :  { %v1284_v6 = vadd.f32 %v2404_v0, %v3537_v28  ;;  %v3649_v9 = vadd.f32 %v2513_v3, %v1281_v63  ;;  %v2516_v11 = vadd.f32 %v2515_v8, %v2514_v5 }
 0x155   :  { %v2405_v13 = vpop.f32.mrb[48].mxu0  ;;  %v3651_v14 = vadd.f32 %v2516_v11, %v1284_v6 }
 0x156   :  { %v2406_v16 = vpop.f32.mrb[49].mxu0 }
 0x157   :  { %v2407_v17 = vadd.f32 %v2406_v16, %v2405_v13  ;;  %v2408_v18 = vpop.f32.mrb[50].mxu0  ;;  %v2517_v19 = vpop.f32.mrb[48].mxu1 }
 0x158   :  { %v2409_v21 = vpop.f32.mrb[51].mxu0  ;;  %v2518_v25 = vpop.f32.mrb[49].mxu1 }
 0x159   :  { %v1289_v22 = vadd.f32 %v2407_v17, %v3537_v28  ;;  %v2410_v24 = vadd.f32 %v2409_v21, %v2408_v18  ;;  %v2519_v26 = vadd.f32 %v2518_v25, %v2517_v19  ;;  %v2520_v29 = vpop.f32.mrb[50].mxu1 }
 0x15a   :  { %v2521_v33 = vpop.f32.mrb[51].mxu1 }
 0x15b   :  { %v1292_v30 = vadd.f32 %v2410_v24, %v3537_v28  ;;  %v3655_v35 = vadd.f32 %v2519_v26, %v1289_v22  ;;  %v2522_v36 = vadd.f32 %v2521_v33, %v2520_v29 }
 0x15d   :  { %v2411_v37 = vpop.f32.mrb[52].mxu0  ;;  %v3657_v38 = vadd.f32 %v2522_v36, %v1292_v30 }
 0x15e   :  { %v2412_v40 = vpop.f32.mrb[53].mxu0 }
 0x15f   :  { %v2413_v41 = vadd.f32 %v2412_v40, %v2411_v37  ;;  %v2414_v43 = vpop.f32.mrb[54].mxu0  ;;  %v2523_v44 = vpop.f32.mrb[52].mxu1 }
 0x160   :  { %v2415_v46 = vpop.f32.mrb[55].mxu0  ;;  %v2524_v52 = vpop.f32.mrb[53].mxu1 }
 0x161   :  { %v1297_v47 = vadd.f32 %v2413_v41, %v3537_v28  ;;  %v2416_v49 = vadd.f32 %v2415_v46, %v2414_v43  ;;  %v2525_v53 = vadd.f32 %v2524_v52, %v2523_v44  ;;  %v2526_v56 = vpop.f32.mrb[54].mxu1 }
 0x162   :  { %v2527_v59 = vpop.f32.mrb[55].mxu1 }
 0x163   :  { %v1300_v57 = vadd.f32 %v2416_v49, %v3537_v28  ;;  %v3661_v60 = vadd.f32 %v2525_v53, %v1297_v47  ;;  %v2528_v62 = vadd.f32 %v2527_v59, %v2526_v56 }
 0x165   :  { %v2417_v63 = vpop.f32.mrb[56].mxu0  ;;  %v3663_v0 = vadd.f32 %v2528_v62, %v1300_v57 }
 0x166   :  { %v2418_v2 = vpop.f32.mrb[57].mxu0 }
 0x167   :  { %v2419_v3 = vadd.f32 %v2418_v2, %v2417_v63  ;;  %v2420_v5 = vpop.f32.mrb[58].mxu0  ;;  %v2529_v6 = vpop.f32.mrb[56].mxu1 }
 0x168   :  { %v2421_v8 = vpop.f32.mrb[59].mxu0  ;;  %v2530_v16 = vpop.f32.mrb[57].mxu1 }
 0x169   :  { %v1305_v11 = vadd.f32 %v2419_v3, %v3537_v28  ;;  %v2422_v13 = vadd.f32 %v2421_v8, %v2420_v5  ;;  %v2531_v17 = vadd.f32 %v2530_v16, %v2529_v6  ;;  %v2532_v18 = vpop.f32.mrb[58].mxu1 }
 0x16a   :  { %v2533_v21 = vpop.f32.mrb[59].mxu1 }
 0x16b   :  { %v1308_v19 = vadd.f32 %v2422_v13, %v3537_v28  ;;  %v3667_v22 = vadd.f32 %v2531_v17, %v1305_v11  ;;  %v2534_v24 = vadd.f32 %v2533_v21, %v2532_v18 }
 0x16d   :  { %v2423_v25 = vpop.f32.mrb[60].mxu0  ;;  %v3669_v26 = vadd.f32 %v2534_v24, %v1308_v19 }
 0x16e   :  { %v2424_v29 = vpop.f32.mrb[61].mxu0 }
 0x16f   :  { %v2425_v30 = vadd.f32 %v2424_v29, %v2423_v25  ;;  %v2426_v33 = vpop.f32.mrb[62].mxu0  ;;  %v2535_v36 = vpop.f32.mrb[60].mxu1 }
 0x170   :  { %v2427_v37 = vpop.f32.mrb[63].mxu0  ;;  %v2536_v43 = vpop.f32.mrb[61].mxu1 }
 0x171   :  { %v1313_v40 = vadd.f32 %v2425_v30, %v3537_v28  ;;  %v2428_v41 = vadd.f32 %v2427_v37, %v2426_v33  ;;  %v2537_v44 = vadd.f32 %v2536_v43, %v2535_v36  ;;  %v2538_v46 = vpop.f32.mrb[62].mxu1 }
 0x172   :  { %v2539_v49 = vpop.f32.mrb[63].mxu1 }
 0x173   :  { %v1316_v47 = vadd.f32 %v2428_v41, %v3537_v28  ;;  %v3673_v52 = vadd.f32 %v2537_v44, %v1313_v40  ;;  %v2540_v53 = vadd.f32 %v2539_v49, %v2538_v46 }
 0x175   :  { %v2557_v56 = vpop.f32.mrb[64].mxu0  ;;  %v3675_v57 = vadd.f32 %v2540_v53, %v1316_v47 }
 0x176   :  { %v2558_v59 = vpop.f32.mrb[65].mxu0 }
 0x177   :  { %v2559_v62 = vadd.f32 %v2558_v59, %v2557_v56  ;;  %v2560_v63 = vpop.f32.mrb[66].mxu0  ;;  %v2698_v3 = vpop.f32.mrb[64].mxu1 }
 0x178   :  { %v2561_v2 = vpop.f32.mrb[67].mxu0  ;;  %v1675_v8 = vpop.f32.mrb[65].mxu1 }
 0x179   :  { %v2562_v5 = vadd.f32 %v2561_v2, %v2560_v63  ;;  %v1515_v6 = vadd.f32 %v2559_v62, %v3553_v45  ;;  %v2699_v11 = vpop.f32.mrb[66].mxu1 }
 0x17a   :  { %v1678_v16 = vpop.f32.mrb[67].mxu1 }
 0x17b   :  { %v1676_v13 = vadd.f32 %v1675_v8, %v1515_v6  ;;  %v1518_v28 = vadd.f32 %v2562_v5, %v3555_v48 }
 0x17d   :  { %v1679_v17 = vadd.f32 %v1678_v16, %v1518_v28  ;;  %v2563_v18 = vpop.f32.mrb[68].mxu0  ;;  %v1802_v21 = vmax.f32 %v1676_v13, 0.0 }
 0x17e   :  { %v2564_v19 = vpop.f32.mrb[69].mxu0 }
 0x17f   :  { %v1803_v24 = vmax.f32 %v1679_v17, 0.0  ;;  %v2565_v25 = vadd.f32 %v2564_v19, %v2563_v18  ;;  %v2566_v29 = vpop.f32.mrb[70].mxu0  ;;  %v2702_v33 = vpop.f32.mrb[68].mxu1 }
 0x180   :  { %v2567_v30 = vpop.f32.mrb[71].mxu0  ;;  %v1691_v45 = vpop.f32.mrb[69].mxu1 }
 0x181   :  { %v1834_v36 = vpack.c.bf16 %v1803_v24, %v1802_v21  ;;  %v1523_v37 = vadd.f32 %v2565_v25, %v3571_v1  ;;  %v2568_v40 = vadd.f32 %v2567_v30, %v2566_v29  ;;  %v2703_v41 = vpop.f32.mrb[70].mxu1 }
 0x182   :  { %v1694_v48 = vpop.f32.mrb[71].mxu1 }
 0x183   :  { %v1684_v43 = vadd.f32 %v2698_v3, %v1523_v37  ;;  %v1526_v44 = vadd.f32 %v2568_v40, %v3573_v4  ;;  %2744 = vmatprep.mubr.bf16.mxu1 %v1834_v36 }
 0x185   :  { %v1687_v46 = vadd.f32 %v2699_v11, %v1526_v44  ;;  %v2569_v47 = vpop.f32.mrb[72].mxu0  ;;  %v1804_v53 = vmax.f32 %v1684_v43, 0.0 }
 0x186   :  { %v2570_v49 = vpop.f32.mrb[73].mxu0 }
 0x187   :  { %v1805_v56 = vmax.f32 %v1687_v46, 0.0  ;;  %v2571_v59 = vadd.f32 %v2570_v49, %v2569_v47  ;;  %v2572_v62 = vpop.f32.mrb[74].mxu0  ;;  %v2706_v2 = vpop.f32.mrb[72].mxu1 }
 0x188   :  { %v2573_v63 = vpop.f32.mrb[75].mxu0  ;;  %v1707_v8 = vpop.f32.mrb[73].mxu1 }
 0x189   :  { %v1835_v5 = vpack.c.bf16 %v1805_v56, %v1804_v53  ;;  %v2574_v6 = vadd.f32 %v2573_v63, %v2572_v62  ;;  %v1531_v1 = vadd.f32 %v2571_v59, %v3586_v20  ;;  %v2707_v13 = vpop.f32.mrb[74].mxu1 }
 0x18a   :  { %v1710_v28 = vpop.f32.mrb[75].mxu1 }
 0x18b   :  { %v1692_v3 = vadd.f32 %v1691_v45, %v1531_v1  ;;  %2745 = vmatmul.mubr.bf16.vlgmr.msra.gmra.mrb[96].mxu1 %v1835_v5  ;;  %v1534_v4 = vadd.f32 %v2574_v6, %v3588_v23 }
 0x18d   :  { %v1695_v11 = vadd.f32 %v1694_v48, %v1534_v4  ;;  %v2575_v16 = vpop.f32.mrb[76].mxu0  ;;  %v1806_v18 = vmax.f32 %v1692_v3, 0.0 }
 0x18e   :  { %v2576_v17 = vpop.f32.mrb[77].mxu0 }
 0x18f   :  { %v1807_v19 = vmax.f32 %v1695_v11, 0.0  ;;  %v2577_v21 = vadd.f32 %v2576_v17, %v2575_v16  ;;  %v2578_v24 = vpop.f32.mrb[78].mxu0  ;;  %v3683_v29 = vpop.f32.mrb[76].mxu1 }
 0x190   :  { %v2579_v25 = vpop.f32.mrb[79].mxu0  ;;  %v1723_v37 = vpop.f32.mrb[77].mxu1 }
 0x191   :  { %v1836_v30 = vpack.c.bf16 %v1807_v19, %v1806_v18  ;;  %v1539_v20 = vadd.f32 %v2577_v21, %v3598_v39  ;;  %v2580_v36 = vadd.f32 %v2579_v25, %v2578_v24  ;;  %v3686_v40 = vpop.f32.mrb[78].mxu1 }
 0x192   :  { %v1726_v43 = vpop.f32.mrb[79].mxu1 }
 0x193   :  { %v1700_v45 = vadd.f32 %v2702_v33, %v1539_v20  ;;  %v1542_v23 = vadd.f32 %v2580_v36, %v3600_v42  ;;  %2748 = vmatprep.mubr.bf16.mxu1 %v1836_v30 }
 0x195   :  { %v1703_v44 = vadd.f32 %v2703_v41, %v1542_v23  ;;  %v2581_v48 = vpop.f32.mrb[80].mxu0  ;;  %v1808_v47 = vmax.f32 %v1700_v45, 0.0 }
 0x196   :  { %v2582_v46 = vpop.f32.mrb[81].mxu0 }
 0x197   :  { %v1809_v49 = vmax.f32 %v1703_v44, 0.0  ;;  %v2583_v53 = vadd.f32 %v2582_v46, %v2581_v48  ;;  %v2584_v56 = vpop.f32.mrb[82].mxu0  ;;  %v3689_v62 = vpop.f32.mrb[80].mxu1 }
 0x198   :  { %v2585_v59 = vpop.f32.mrb[83].mxu0  ;;  %v3692_v6 = vpop.f32.mrb[81].mxu1 }
 0x199   :  { %v2586_v39 = vadd.f32 %v2585_v59, %v2584_v56  ;;  %v1547_v63 = vadd.f32 %v2583_v53, %v3607_v58  ;;  %v1837_v5 = vpack.c.bf16 %v1809_v49, %v1808_v47  ;;  %v3694_v33 = vpop.f32.mrb[82].mxu1 }
 0x19a   :  { %v3697_v1 = vpop.f32.mrb[83].mxu1 }
 0x19b   :  { %v1708_v42 = vadd.f32 %v1707_v8, %v1547_v63  ;;  %2749 = vmatmul.mubr.bf16.gmra.mrb[100].mxu1 %v1837_v5  ;;  %v1550_v41 = vadd.f32 %v2586_v39, %v3609_v61 }
 0x19d   :  { %v1711_v3 = vadd.f32 %v1710_v28, %v1550_v41  ;;  %v2587_v4 = vpop.f32.mrb[84].mxu0  ;;  %v1810_v16 = vmax.f32 %v1708_v42, 0.0 }
 0x19e   :  { %v2588_v11 = vpop.f32.mrb[85].mxu0 }
 0x19f   :  { %v1811_v17 = vmax.f32 %v1711_v3, 0.0  ;;  %v2589_v18 = vadd.f32 %v2588_v11, %v2587_v4  ;;  %v2590_v19 = vpop.f32.mrb[86].mxu0  ;;  %v3699_v58 = vpop.f32.mrb[84].mxu1 }
 0x1a0   :  { %v2591_v21 = vpop.f32.mrb[87].mxu0  ;;  %v3702_v8 = vpop.f32.mrb[85].mxu1 }
 0x1a1   :  { %v1838_v24 = vpack.c.bf16 %v1811_v17, %v1810_v16  ;;  %v1555_v25 = vadd.f32 %v2589_v18, %v3613_v12  ;;  %v2592_v30 = vadd.f32 %v2591_v21, %v2590_v19  ;;  %v3704_v20 = vpop.f32.mrb[86].mxu1 }
 0x1a2   :  { %v3707_v36 = vpop.f32.mrb[87].mxu1 }
 0x1a3   :  { %v1716_v61 = vadd.f32 %v2706_v2, %v1555_v25  ;;  %v1558_v28 = vadd.f32 %v2592_v30, %v3615_v15  ;;  %2752 = vmatprep.mubr.bf16.mxu1 %v1838_v24 }
 0x1a5   :  { %v1719_v45 = vadd.f32 %v2707_v13, %v1558_v28  ;;  %v2593_v23 = vpop.f32.mrb[88].mxu0  ;;  %v1812_v48 = vmax.f32 %v1716_v61, 0.0 }
 0x1a6   :  { %v2594_v44 = vpop.f32.mrb[89].mxu0 }
 0x1a7   :  { %v1813_v46 = vmax.f32 %v1719_v45, 0.0  ;;  %v2595_v47 = vadd.f32 %v2594_v44, %v2593_v23  ;;  %v2596_v49 = vpop.f32.mrb[90].mxu0  ;;  %v3709_v12 = vpop.f32.mrb[88].mxu1 }
 0x1a8   :  { %v2597_v53 = vpop.f32.mrb[91].mxu0  ;;  %v3712_v2 = vpop.f32.mrb[89].mxu1 }
 0x1a9   :  { %v2598_v56 = vadd.f32 %v2597_v53, %v2596_v49  ;;  %v1563_v59 = vadd.f32 %v2595_v47, %v3619_v31  ;;  %v1839_v39 = vpack.c.bf16 %v1813_v46, %v1812_v48  ;;  %v3714_v15 = vpop.f32.mrb[90].mxu1 }
 0x1aa   :  { %v3717_v5 = vpop.f32.mrb[91].mxu1 }
 0x1ab   :  { %v1724_v63 = vadd.f32 %v1723_v37, %v1563_v59  ;;  %2753 = vmatmul.mubr.bf16.gmra.mrb[104].mxu1 %v1839_v39  ;;  %v1566_v13 = vadd.f32 %v2598_v56, %v3621_v34 }
 0x1ad   :  { %v1727_v42 = vadd.f32 %v1726_v43, %v1566_v13  ;;  %v2599_v41 = vpop.f32.mrb[92].mxu0  ;;  %v1814_v4 = vmax.f32 %v1724_v63, 0.0 }
 0x1ae   :  { %v2600_v3 = vpop.f32.mrb[93].mxu0 }
 0x1af   :  { %v1815_v11 = vmax.f32 %v1727_v42, 0.0  ;;  %v2601_v16 = vadd.f32 %v2600_v3, %v2599_v41  ;;  %v2602_v17 = vpop.f32.mrb[94].mxu0  ;;  %v3719_v31 = vpop.f32.mrb[92].mxu1 }
 0x1b0   :  { %v2603_v18 = vpop.f32.mrb[95].mxu0  ;;  %v3722_v37 = vpop.f32.mrb[93].mxu1 }
 0x1b1   :  { %v1840_v19 = vpack.c.bf16 %v1815_v11, %v1814_v4  ;;  %v1571_v21 = vadd.f32 %v2601_v16, %v3625_v51  ;;  %v2604_v24 = vadd.f32 %v2603_v18, %v2602_v17  ;;  %v3724_v25 = vpop.f32.mrb[94].mxu1 }
 0x1b2   :  { %v3728_v30 = vpop.f32.mrb[95].mxu1 }
 0x1b3   :  { %v1732_v34 = vadd.f32 %v3683_v29, %v1571_v21  ;;  %v1574_v43 = vadd.f32 %v2604_v24, %v3627_v54  ;;  %2756 = vmatprep.mubr.bf16.mxu1 %v1840_v19 }
 0x1b5   :  { %v1735_v61 = vadd.f32 %v3686_v40, %v1574_v43  ;;  %v2605_v28 = vpop.f32.mrb[96].mxu0  ;;  %v1816_v23 = vmax.f32 %v1732_v34, 0.0 }
 0x1b6   :  { %v2606_v45 = vpop.f32.mrb[97].mxu0 }
 0x1b7   :  { %v1817_v44 = vmax.f32 %v1735_v61, 0.0  ;;  %v2607_v48 = vadd.f32 %v2606_v45, %v2605_v28  ;;  %v2608_v51 = vpop.f32.mrb[98].mxu0 }
 0x1b8   :  { %v2609_v46 = vpop.f32.mrb[99].mxu0 }
 0x1b9   :  { %v2610_v47 = vadd.f32 %v2609_v46, %v2608_v51  ;;  %v1579_v49 = vadd.f32 %v2607_v48, %v3631_v7  ;;  %v1841_v53 = vpack.c.bf16 %v1817_v44, %v1816_v23 }
 0x1bb   :  { %v1740_v29 = vadd.f32 %v3692_v6, %v1579_v49  ;;  %2757 = vmatmul.mubr.bf16.gmra.mrb[108].mxu1 %v1841_v53  ;;  %v1582_v54 = vadd.f32 %v2610_v47, %v3633_v10 }
 0x1bd   :  { %v1743_v56 = vadd.f32 %v3697_v1, %v1582_v54  ;;  %v2611_v59 = vpop.f32.mrb[100].mxu0  ;;  %v1818_v39 = vmax.f32 %v1740_v29, 0.0 }
 0x1be   :  { %v2612_v40 = vpop.f32.mrb[101].mxu0 }
 0x1bf   :  { %v1819_v63 = vmax.f32 %v1743_v56, 0.0  ;;  %v2613_v13 = vadd.f32 %v2612_v40, %v2611_v59  ;;  %v2614_v42 = vpop.f32.mrb[102].mxu0 }
 0x1c0   :  { %v2615_v41 = vpop.f32.mrb[103].mxu0 }
 0x1c1   :  { %v1842_v3 = vpack.c.bf16 %v1819_v63, %v1818_v39  ;;  %v1587_v4 = vadd.f32 %v2613_v13, %v3637_v27  ;;  %v2616_v11 = vadd.f32 %v2615_v41, %v2614_v42 }
 0x1c3   :  { %v1748_v7 = vadd.f32 %v3689_v62, %v1587_v4  ;;  %v1590_v6 = vadd.f32 %v2616_v11, %v3639_v32  ;;  %2760 = vmatprep.mubr.bf16.mxu1 %v1842_v3 }
 0x1c5   :  { %v1751_v10 = vadd.f32 %v3694_v33, %v1590_v6  ;;  %v2617_v16 = vpop.f32.mrb[104].mxu0  ;;  %v1820_v17 = vmax.f32 %v1748_v7, 0.0 }
 0x1c6   :  { %v2618_v1 = vpop.f32.mrb[105].mxu0 }
 0x1c7   :  { %v1821_v18 = vmax.f32 %v1751_v10, 0.0  ;;  %v2619_v19 = vadd.f32 %v2618_v1, %v2617_v16  ;;  %v2620_v21 = vpop.f32.mrb[106].mxu0 }
 0x1c8   :  { %v2621_v24 = vpop.f32.mrb[107].mxu0 }
 0x1c9   :  { %v2622_v34 = vadd.f32 %v2621_v24, %v2620_v21  ;;  %v1595_v43 = vadd.f32 %v2619_v19, %v3643_v50  ;;  %v1843_v61 = vpack.c.bf16 %v1821_v18, %v1820_v17 }
 0x1cb   :  { %v1756_v27 = vadd.f32 %v3702_v8, %v1595_v43  ;;  %2761 = vmatmul.mubr.bf16.gmra.mrb[112].mxu1 %v1843_v61  ;;  %v1598_v62 = vadd.f32 %v2622_v34, %v3645_v55 }
 0x1cd   :  { %v1759_v32 = vadd.f32 %v3707_v36, %v1598_v62  ;;  %v2623_v28 = vpop.f32.mrb[108].mxu0  ;;  %v1822_v45 = vmax.f32 %v1756_v27, 0.0 }
 0x1ce   :  { %v2624_v33 = vpop.f32.mrb[109].mxu0 }
 0x1cf   :  { %v1823_v23 = vmax.f32 %v1759_v32, 0.0  ;;  %v2625_v44 = vadd.f32 %v2624_v33, %v2623_v28  ;;  %v2626_v48 = vpop.f32.mrb[110].mxu0 }
 0x1d0   :  { %v2627_v51 = vpop.f32.mrb[111].mxu0 }
 0x1d1   :  { %v1844_v46 = vpack.c.bf16 %v1823_v23, %v1822_v45  ;;  %v1603_v47 = vadd.f32 %v2625_v44, %v3649_v9  ;;  %v2628_v49 = vadd.f32 %v2627_v51, %v2626_v48 }
 0x1d3   :  { %v1764_v50 = vadd.f32 %v3699_v58, %v1603_v47  ;;  %v1606_v8 = vadd.f32 %v2628_v49, %v3651_v14  ;;  %2764 = vmatprep.mubr.bf16.mxu1 %v1844_v46  ;;  %v3766_v47 = vld [vmem:[%s3816_s4] ss:$0 sm:$0xff]  ;;  %s3020_s4 = smov [#allocation2]  }
 0x1d4   :  { %s2119_s25 = sshll.u32 %s3020_s4, 4  ;;  %s2120_s25 = int_to_ptr.vmem [resolvable:$true] %s2119_s25 }
 0x1d5   :  { %v1767_v55 = vadd.f32 %v3704_v20, %v1606_v8  ;;  %v2629_v53 = vpop.f32.mrb[112].mxu0  ;;  %v1824_v29 = vmax.f32 %v1764_v50, 0.0  ;;  %s2996_s26 = scalar_lea.vmem %s2120_s25, 4096  ;;  %p3001_p1 = scmp.lt.s32.totalorder %s2120_s25, %s2120_s25 }
 0x1d6   :  { %v2630_v36 = vpop.f32.mrb[113].mxu0  ;;  %p2997_p0 = scmp.ne.s32.totalorder %s2120_s25, %s2996_s26  ;;  %p3002_p2 = scmp.lt.s32.totalorder %s2996_s26, %s2996_s26 }
 0x1d7   :  { %v1825_v54 = vmax.f32 %v1767_v55, 0.0  ;;  %v2631_v56 = vadd.f32 %v2630_v36, %v2629_v53  ;;  %v2632_v59 = vpop.f32.mrb[114].mxu0 }
 0x1d8   :  { %v2633_v40 = vpop.f32.mrb[115].mxu0  ;;  %p3003_p3 = por %p3002_p2, %p3001_p1 }
 0x1d9   :  { %v2634_v39 = vadd.f32 %v2633_v40, %v2632_v59  ;;  %v1611_v63 = vadd.f32 %v2631_v56, %v3655_v35  ;;  %v1845_v13 = vpack.c.bf16 %v1825_v54, %v1824_v29 }
 0x1da   :  { %p3004_p4 = pnand %p3003_p3, %p2997_p0 }
 0x1db   :  { %v1772_v9 = vadd.f32 %v3712_v2, %v1611_v63  ;;  %2765 = vmatmul.mubr.bf16.gmra.mrb[116].mxu1 %v1845_v13  ;;  %v1614_v58 = vadd.f32 %v2634_v39, %v3657_v38 }
 0x1dd   :  { %v1775_v14 = vadd.f32 %v3717_v5, %v1614_v58  ;;  %v2635_v42 = vpop.f32.mrb[116].mxu0  ;;  %v1826_v41 = vmax.f32 %v1772_v9, 0.0 }
 0x1de   :  { %v2636_v20 = vpop.f32.mrb[117].mxu0 }
 0x1df   :  { %v1827_v3 = vmax.f32 %v1775_v14, 0.0  ;;  %v2637_v4 = vadd.f32 %v2636_v20, %v2635_v42  ;;  %v2638_v11 = vpop.f32.mrb[118].mxu0 }
 0x1e0   :  { %v2639_v7 = vpop.f32.mrb[119].mxu0 }
 0x1e1   :  { %v1846_v6 = vpack.c.bf16 %v1827_v3, %v1826_v41  ;;  %v1619_v10 = vadd.f32 %v2637_v4, %v3661_v60  ;;  %v2640_v16 = vadd.f32 %v2639_v7, %v2638_v11 }
 0x1e3   :  { %v1780_v35 = vadd.f32 %v3709_v12, %v1619_v10  ;;  %v1622_v2 = vadd.f32 %v2640_v16, %v3663_v0  ;;  %2768 = vmatprep.mubr.bf16.mxu1 %v1846_v6 }
 0x1e5   :  { %v1783_v38 = vadd.f32 %v3714_v15, %v1622_v2  ;;  %v2641_v1 = vpop.f32.mrb[120].mxu0  ;;  %v1828_v17 = vmax.f32 %v1780_v35, 0.0 }
 0x1e6   :  { %v2642_v5 = vpop.f32.mrb[121].mxu0 }
 0x1e7   :  { %v1829_v18 = vmax.f32 %v1783_v38, 0.0  ;;  %v2643_v19 = vadd.f32 %v2642_v5, %v2641_v1  ;;  %v2644_v21 = vpop.f32.mrb[122].mxu0 }
 0x1e8   :  { %v2645_v24 = vpop.f32.mrb[123].mxu0 }
 0x1e9   :  { %v2646_v34 = vadd.f32 %v2645_v24, %v2644_v21  ;;  %v1627_v43 = vadd.f32 %v2643_v19, %v3667_v22  ;;  %v1847_v61 = vpack.c.bf16 %v1829_v18, %v1828_v17 }
 0x1eb   :  { %v1788_v60 = vadd.f32 %v3722_v37, %v1627_v43  ;;  %2769 = vmatmul.mubr.bf16.gmra.mrb[120].mxu1 %v1847_v61  ;;  %v1630_v12 = vadd.f32 %v2646_v34, %v3669_v26 }
 0x1ed   :  { %v1791_v0 = vadd.f32 %v3728_v30, %v1630_v12  ;;  %v2647_v27 = vpop.f32.mrb[124].mxu0  ;;  %v1830_v62 = vmax.f32 %v1788_v60, 0.0 }
 0x1ee   :  { %v2648_v15 = vpop.f32.mrb[125].mxu0 }
 0x1ef   :  { %v1831_v32 = vmax.f32 %v1791_v0, 0.0  ;;  %v2649_v28 = vadd.f32 %v2648_v15, %v2647_v27  ;;  %v2650_v33 = vpop.f32.mrb[126].mxu0 }
 0x1f0   :  { %v2651_v45 = vpop.f32.mrb[127].mxu0 }
 0x1f1   :  { %v1848_v23 = vpack.c.bf16 %v1831_v32, %v1830_v62  ;;  %v1635_v44 = vadd.f32 %v2649_v28, %v3673_v52  ;;  %v2652_v48 = vadd.f32 %v2651_v45, %v2650_v33 }
 0x1f3   :  { %v1796_v22 = vadd.f32 %v3719_v31, %v1635_v44  ;;  %v1638_v37 = vadd.f32 %v2652_v48, %v3675_v57  ;;  %2772 = vmatprep.mubr.bf16.mxu1 %v1848_v23 }
 0x1f5   :  { %v1799_v26 = vadd.f32 %v3724_v25, %v1638_v37  ;;  %v1832_v51 = vmax.f32 %v1796_v22, 0.0 }
 0x1f7   :  { %v1833_v30 = vmax.f32 %v1799_v26, 0.0 }
 0x1f9   :  { %v1849_v46 = vpack.c.bf16 %v1833_v30, %v1832_v51 }
 0x1fb   :  { %2773 = vmatmul.mubr.bf16.gmra.mrb[124].mxu1 %v1849_v46 }
 0x25e   :  { %v2746_v49 = vpop.f32.mrb[96].mxu1 }
 0x25f   :  { %v1964_v52 = vadd.f32 %v2746_v49, %v3766_v47  ;;  %v1955_v50 = vpop.f32.mrb[97].mxu1 }
 0x260   :  { %v1956_v31 = vadd.f32 %v3766_v47, %v1955_v50  ;;  %v2747_v8 = vpop.f32.mrb[98].mxu1 }
 0x261   :  { %2084 = vst [vmem:[#allocation2 + $0x10] sm:$0xff] %v1964_v52  ;;  %v1967_v57 = vadd.f32 %v2747_v8, %v3766_v47  ;;  %v1958_v25 = vpop.f32.mrb[99].mxu1 }
 0x262   :  { %2082 = vst [vmem:[#allocation2] sm:$0xff] %v1956_v31  ;;  %v1959_v55 = vadd.f32 %v3766_v47, %v1958_v25 }
 0x263   :  { %2085 = vst [vmem:[#allocation2 + $0x18] sm:$0xff] %v1967_v57 }
 0x264   :  { %2083 = vst [vmem:[#allocation2 + $0x8] sm:$0xff] %v1959_v55 }
 0x26e   :  { %v2750_v53 = vpop.f32.mrb[100].mxu1 }
 0x26f   :  { %v1980_v36 = vadd.f32 %v2750_v53, %v3766_v47  ;;  %v1971_v29 = vpop.f32.mrb[101].mxu1 }
 0x270   :  { %v1972_v54 = vadd.f32 %v3766_v47, %v1971_v29  ;;  %v2751_v56 = vpop.f32.mrb[102].mxu1 }
 0x271   :  { %2088 = vst [vmem:[#allocation2 + $0x30] sm:$0xff] %v1980_v36  ;;  %v1983_v59 = vadd.f32 %v2751_v56, %v3766_v47  ;;  %v1974_v40 = vpop.f32.mrb[103].mxu1 }
 0x272   :  { %2086 = vst [vmem:[#allocation2 + $0x20] sm:$0xff] %v1972_v54  ;;  %v1975_v39 = vadd.f32 %v3766_v47, %v1974_v40 }
 0x273   :  { %2089 = vst [vmem:[#allocation2 + $0x38] sm:$0xff] %v1983_v59 }
 0x274   :  { %2087 = vst [vmem:[#allocation2 + $0x28] sm:$0xff] %v1975_v39 }
 0x27e   :  { %v2754_v63 = vpop.f32.mrb[104].mxu1 }
 0x27f   :  { %v1996_v13 = vadd.f32 %v2754_v63, %v3766_v47  ;;  %v1987_v9 = vpop.f32.mrb[105].mxu1 }
 0x280   :  { %v1988_v58 = vadd.f32 %v3766_v47, %v1987_v9  ;;  %v2755_v14 = vpop.f32.mrb[106].mxu1 }
 0x281   :  { %2092 = vst [vmem:[#allocation2 + $0x50] sm:$0xff] %v1996_v13  ;;  %v1999_v42 = vadd.f32 %v2755_v14, %v3766_v47  ;;  %v1990_v20 = vpop.f32.mrb[107].mxu1 }
 0x282   :  { %2090 = vst [vmem:[#allocation2 + $0x40] sm:$0xff] %v1988_v58  ;;  %v1991_v41 = vadd.f32 %v3766_v47, %v1990_v20 }
 0x283   :  { %2093 = vst [vmem:[#allocation2 + $0x58] sm:$0xff] %v1999_v42 }
 0x284   :  { %2091 = vst [vmem:[#allocation2 + $0x48] sm:$0xff] %v1991_v41 }
 0x28e   :  { %v2758_v3 = vpop.f32.mrb[108].mxu1 }
 0x28f   :  { %v2012_v4 = vadd.f32 %v2758_v3, %v3766_v47  ;;  %v2003_v11 = vpop.f32.mrb[109].mxu1 }
 0x290   :  { %v2004_v7 = vadd.f32 %v3766_v47, %v2003_v11  ;;  %v2759_v6 = vpop.f32.mrb[110].mxu1 }
 0x291   :  { %2096 = vst [vmem:[#allocation2 + $0x70] sm:$0xff] %v2012_v4  ;;  %v2015_v10 = vadd.f32 %v2759_v6, %v3766_v47  ;;  %v2006_v16 = vpop.f32.mrb[111].mxu1 }
 0x292   :  { %2094 = vst [vmem:[#allocation2 + $0x60] sm:$0xff] %v2004_v7  ;;  %v2007_v35 = vadd.f32 %v3766_v47, %v2006_v16 }
 0x293   :  { %2097 = vst [vmem:[#allocation2 + $0x78] sm:$0xff] %v2015_v10 }
 0x294   :  { %2095 = vst [vmem:[#allocation2 + $0x68] sm:$0xff] %v2007_v35 }
 0x29e   :  { %v2762_v2 = vpop.f32.mrb[112].mxu1 }
 0x29f   :  { %v2028_v38 = vadd.f32 %v2762_v2, %v3766_v47  ;;  %v2019_v1 = vpop.f32.mrb[113].mxu1 }
 0x2a0   :  { %v2020_v5 = vadd.f32 %v3766_v47, %v2019_v1  ;;  %v2763_v17 = vpop.f32.mrb[114].mxu1 }
 0x2a1   :  { %2100 = vst [vmem:[#allocation2 + $0x90] sm:$0xff] %v2028_v38  ;;  %v2031_v18 = vadd.f32 %v2763_v17, %v3766_v47  ;;  %v2022_v19 = vpop.f32.mrb[115].mxu1 }
 0x2a2   :  { %2098 = vst [vmem:[#allocation2 + $0x80] sm:$0xff] %v2020_v5  ;;  %v2023_v21 = vadd.f32 %v3766_v47, %v2022_v19 }
 0x2a3   :  { %2101 = vst [vmem:[#allocation2 + $0x98] sm:$0xff] %v2031_v18 }
 0x2a4   :  { %2099 = vst [vmem:[#allocation2 + $0x88] sm:$0xff] %v2023_v21 }
 0x2ae   :  { %v2766_v24 = vpop.f32.mrb[116].mxu1 }
 0x2af   :  { %v2044_v34 = vadd.f32 %v2766_v24, %v3766_v47  ;;  %v2035_v43 = vpop.f32.mrb[117].mxu1 }
 0x2b0   :  { %v2036_v61 = vadd.f32 %v3766_v47, %v2035_v43  ;;  %v2767_v60 = vpop.f32.mrb[118].mxu1 }
 0x2b1   :  { %2104 = vst [vmem:[#allocation2 + $0xb0] sm:$0xff] %v2044_v34  ;;  %v2047_v12 = vadd.f32 %v2767_v60, %v3766_v47  ;;  %v2038_v0 = vpop.f32.mrb[119].mxu1 }
 0x2b2   :  { %2102 = vst [vmem:[#allocation2 + $0xa0] sm:$0xff] %v2036_v61  ;;  %v2039_v27 = vadd.f32 %v3766_v47, %v2038_v0 }
 0x2b3   :  { %2105 = vst [vmem:[#allocation2 + $0xb8] sm:$0xff] %v2047_v12 }
 0x2b4   :  { %2103 = vst [vmem:[#allocation2 + $0xa8] sm:$0xff] %v2039_v27 }
 0x2be   :  { %v2770_v15 = vpop.f32.mrb[120].mxu1 }
 0x2bf   :  { %v2060_v62 = vadd.f32 %v2770_v15, %v3766_v47  ;;  %v2051_v32 = vpop.f32.mrb[121].mxu1 }
 0x2c0   :  { %v2052_v28 = vadd.f32 %v3766_v47, %v2051_v32  ;;  %v2771_v33 = vpop.f32.mrb[122].mxu1 }
 0x2c1   :  { %2108 = vst [vmem:[#allocation2 + $0xd0] sm:$0xff] %v2060_v62  ;;  %v2063_v45 = vadd.f32 %v2771_v33, %v3766_v47  ;;  %v2054_v23 = vpop.f32.mrb[123].mxu1 }
 0x2c2   :  { %2106 = vst [vmem:[#allocation2 + $0xc0] sm:$0xff] %v2052_v28  ;;  %v2055_v44 = vadd.f32 %v3766_v47, %v2054_v23 }
 0x2c3   :  { %2109 = vst [vmem:[#allocation2 + $0xd8] sm:$0xff] %v2063_v45 }
 0x2c4   :  { %2107 = vst [vmem:[#allocation2 + $0xc8] sm:$0xff] %v2055_v44 }
 0x2ce   :  { %v2774_v48 = vpop.f32.mrb[124].mxu1 }
 0x2cf   :  { %v2076_v22 = vadd.f32 %v2774_v48, %v3766_v47  ;;  %v2067_v37 = vpop.f32.mrb[125].mxu1 }
 0x2d0   :  { %v2068_v26 = vadd.f32 %v3766_v47, %v2067_v37  ;;  %v2775_v51 = vpop.f32.mrb[126].mxu1 }
 0x2d1   :  { %2112 = vst [vmem:[#allocation2 + $0xf0] sm:$0xff] %v2076_v22  ;;  %v2079_v30 = vadd.f32 %v2775_v51, %v3766_v47  ;;  %v2070_v46 = vpop.f32.mrb[127].mxu1 }
 0x2d2   :  { %2110 = vst [vmem:[#allocation2 + $0xe0] sm:$0xff] %v2068_v26  ;;  %v2071_v49 = vadd.f32 %v3766_v47, %v2070_v46 }
 0x2d3   :  { %2113 = vst [vmem:[#allocation2 + $0xf8] sm:$0xff] %v2079_v30 }
 0x2d4   :  { %2111 = vst [vmem:[#allocation2 + $0xe8] sm:$0xff] %v2071_v49 }
 0x2d5   :  { %3007 = shalt.err (!%p3004_p4)
}
 0x2d6   :  { %s3008_s29 = scalar_lea.hbm %s3817_s5, 4096 }
 0x2d7   :  { %p3009_p5 = scmp.ne.s32.totalorder %s3817_s5, %s3008_s29  ;;  %p3012_p6 = scmp.lt.u32.totalorder %s3008_s29, %s3817_s5 }
 0x2d9   :  { %p3014_p7 = pnand %p3012_p6, %p3009_p5 }
 0x2db   :  { %3017 = shalt.err (!%p3014_p7)
}
 0x2dc   :  { %s3021_s8 = smov 128   ;;  %s3022_s9 = smov 8  }
 0x2dd   :  { %2125 = dma.vmem_to_hbm [thread:$0]  %s2120_s25, 4096, %s3817_s5, [#allocation3], %s3021_s8, %s3021_s8, %s3022_s9  }
 0x2de   :  { %3018 = dma.done.wait [#allocation3], 4096  }
 0x2df   :  { %3019 = vsyncadd [#allocation3], 4294963200 }
 0x2e0   :  { %2129 = vsyncpa [#allocation3], 1 }

</bundles_post_ra>
